<compile_context>
chip_gen: v5e
topology: v5e:2x2
jax: 0.10.0
libtpu: 0.0.40
codegen_flags: <defaults>
</compile_context>

<pallas_src>
import numpy as np
import jax
import jax.numpy as jnp
from jax.experimental import pallas as pl
from jax.experimental.pallas import tpu as pltpu


def _round_up(v, m):
    return ((v + m - 1) // m) * m


# ----------------------------------------------------------------------------
# Fused Pallas kernel (whole PNN forward in one call)
# ----------------------------------------------------------------------------
def make_fused_pnn_kernel(n_layers, n_tasks, n_out_pad):
    """kernel(x, onehot, w0, b0, cls, (w_l, b_l) for l=1..L-1, out)

    x       : (tb, D)              bf16
    onehot  : (tb, T)              f32
    w0      : (D, T*col_w0)        bf16   (per-column weights concatenated along N)
    b0, cls : (1, T*col_w0)        f32
    w_l     : (T*col_w_{l-1}, T*col_w_l) bf16  (zero-padded lateral structure)
    b_l     : (1, T*col_w_l)       f32
    out     : (tb, n_out_pad)      f32
    """

    def kernel(*refs):
        x_ref, oh_ref, w0_ref, b0_ref, cls_ref = refs[:5]
        wb_refs = refs[5:-1]
        o_ref = refs[-1]

        # ---- layer 0: one matmul shared across columns (N = T*col_w0) ----
        h = jnp.dot(x_ref[...], w0_ref[...], preferred_element_type=jnp.float32)
        h = jnp.maximum(h + b0_ref[...], 0.0) + cls_ref[...]   # contiguous (tb, T*col_w0) slab

        # ---- deeper layers: ONE big zero-padded matmul per layer, slab -> slab ----
        idx = 0
        for _l in range(1, n_layers):
            w_ref = wb_refs[idx]
            b_ref = wb_refs[idx + 1]
            idx += 2
            h = jnp.dot(h.astype(jnp.bfloat16), w_ref[...],
                        preferred_element_type=jnp.float32)
            h = jnp.maximum(h + b_ref[...], 0.0)

        # ---- per-row task selection: one-hot weighted add over column slices ----
        # (out-of-range labels give an all-zero row; the reference gather would differ)
        oh = oh_ref[...]                                        # (tb, T) f32
        out = oh[:, 0:1] * h[:, :n_out_pad]
        for t in range(1, n_tasks):
            out = out + oh[:, t:t + 1] * h[:, t * n_out_pad:(t + 1) * n_out_pad]
        o_ref[...] = out

    return kernel


def pnn_forward(x, task_labels, packed, n_layers, n_tasks, sizes):
    """Fused PNN forward. x: (B,C,H,W) f32, task_labels: (B,) int."""
    B = x.shape[0]
    n_out = sizes[-1]
    n_out_pad = packed["n_out_pad"]

    x_flat = x.reshape(B, -1).astype(jnp.bfloat16)             # torch.flatten(x, 1), bf16 operand
    D = x_flat.shape[1]
    one_hot = (task_labels.reshape(B, 1).astype(jnp.int32)
               == jnp.arange(n_tasks, dtype=jnp.int32)[None, :]).astype(jnp.float32)

    # batch grid (parallel -> both TensorCores on v7x when B grows)
    tb = B if B <= 256 else 128
    assert B % tb == 0, "batch must be divisible by the batch tile"
    grid = (B // tb,)

    args = [x_flat, one_hot, packed["w0"], packed["b0"], packed["cls"]]
    in_specs = [
        pl.BlockSpec((tb, D), lambda i: (i, 0)),
        pl.BlockSpec((tb, n_tasks), lambda i: (i, 0)),
        pl.BlockSpec(packed["w0"].shape, lambda i: (0, 0)),
        pl.BlockSpec(packed["b0"].shape, lambda i: (0, 0)),
        pl.BlockSpec(packed["cls"].shape, lambda i: (0, 0)),
    ]
    for l in range(1, n_layers):
        w = packed["w"][l]
        b = packed["b"][l]
        args += [w, b]
        in_specs += [pl.BlockSpec(w.shape, lambda i: (0, 0)),
                     pl.BlockSpec(b.shape, lambda i: (0, 0))]

    kernel = make_fused_pnn_kernel(n_layers, n_tasks, n_out_pad)
    out_pad = pl.pallas_call(
        kernel,
        out_shape=jax.ShapeDtypeStruct((B, n_out_pad), jnp.float32),
        grid=grid,
        in_specs=in_specs,
        out_specs=pl.BlockSpec((tb, n_out_pad), lambda i: (i, 0)),
        compiler_params=pltpu.CompilerParams(
            dimension_semantics=("parallel",),
            vmem_limit_bytes=32 * 1024 * 1024),
    )(*args)
    return out_pad[:, :n_out]


# ----------------------------------------------------------------------------
# Parameter construction (natural form) + packing for the fused kernel
# ----------------------------------------------------------------------------
def init_pnn_params(key, n_layers, n_tasks, sizes):
    """params[col][depth] = [(w_j (n_in,n_out), b_j (n_out,)) for j in range(J)],
    J = col+1 for depth>0 else 1.  j == col is the main layer, j < col are laterals."""
    params = []
    for col in range(n_tasks):
        column = []
        for depth in range(n_layers):
            n_in, n_out = sizes[depth], sizes[depth + 1]
            J = (col + 1) if depth > 0 else 1
            bound = 1.0 / np.sqrt(n_in)            # PyTorch nn.Linear default init range
            blocks = []
            for _j in range(J):
                key, kw, kb = jax.random.split(key, 3)
                w = jax.random.uniform(kw, (n_in, n_out), jnp.float32, -bound, bound)
                b = jax.random.uniform(kb, (n_out,), jnp.float32, -bound, bound)
                blocks.append((w, b))
            column.append(blocks)
        params.append(column)
    return params


def pack_params(params, n_layers, n_tasks, sizes, n_classes_per_task):
    """Pack into the fused-kernel layout (once, outside the hot path).
    Per-column output widths are padded to a multiple of 128 lanes; padding is encoded
    as zero weight/bias blocks so slices are always lane-aligned and the final store is
    lane-dense.  Weights are cast to bf16; biases / cls stay f32."""
    # padded per-column output width of each layer
    col_w = [_round_up(sizes[l + 1], 128) for l in range(n_layers)]

    # ---- layer 0: concat per-column weights along N (zero-padded per column) ----
    D = sizes[0]
    h1 = sizes[1]
    W0 = np.zeros((D, n_tasks * col_w[0]), dtype=np.float32)
    B0 = np.zeros((1, n_tasks * col_w[0]), dtype=np.float32)
    CLS = np.zeros((1, n_tasks * col_w[0]), dtype=np.float32)
    for i in range(n_tasks):
        w, b = params[i][0][0]
        W0[:, i * col_w[0]:i * col_w[0] + h1] = np.asarray(w)
        B0[0, i * col_w[0]:i * col_w[0] + h1] = np.asarray(b)
        CLS[0, i * col_w[0]:i * col_w[0] + h1] = float(n_classes_per_task[i])

    # ---- deeper layers: one zero-padded big matmul per layer ----
    w_pack, b_pack = {}, {}
    for l in range(1, n_layers):
        h_in = sizes[l]                  # real per-column input width
        in_w = col_w[l - 1]              # padded per-column input width (slab layout)
        n_out = sizes[l + 1]
        out_w = col_w[l]
        W = np.zeros((n_tasks * in_w, n_tasks * out_w), dtype=np.float32)
        Bv = np.zeros((1, n_tasks * out_w), dtype=np.float32)
        for i in range(n_tasks):
            blocks = params[i][l]        # sources j = 0..i
            b_sum = np.zeros((n_out,), dtype=np.float32)
            for j, (w, b) in enumerate(blocks):
                W[j * in_w:j * in_w + h_in,
                  i * out_w:i * out_w + n_out] = np.asarray(w)
                b_sum += np.asarray(b)
            Bv[0, i * out_w:i * out_w + n_out] = b_sum
        w_pack[l] = jnp.asarray(W, dtype=jnp.bfloat16)
        b_pack[l] = jnp.asarray(Bv, dtype=jnp.float32)

    return {"w0": jnp.asarray(W0, dtype=jnp.bfloat16),
            "b0": jnp.asarray(B0, dtype=jnp.float32),
            "cls": jnp.asarray(CLS, dtype=jnp.float32),
            "w": w_pack, "b": b_pack,
            "n_out_pad": col_w[-1]}


# ----------------------------------------------------------------------------
# Pure-JAX f32 reference (mirrors the PyTorch forward) for verification
# ----------------------------------------------------------------------------
def pnn_forward_ref(x, task_labels, params, n_layers, n_classes_per_task):
    n_tasks = len(params)
    B = x.shape[0]
    x_flat = x.reshape(B, -1)
    inputs = []
    for i in range(n_tasks):
        w, b = params[i][0][0]
        inputs.append(jnp.maximum(x_flat @ w + b, 0.0) + jnp.float32(n_classes_per_task[i]))
    for l in range(1, n_layers):
        outputs = []
        for i in range(n_tasks):
            acc = None
            for j, (w, b) in enumerate(params[i][l]):
                term = inputs[j] @ w + b
                acc = term if acc is None else acc + term
            outputs.append(jnp.maximum(acc, 0.0))
        inputs = outputs
    stacked = jnp.stack(inputs, axis=0)                      # (T, B, n_out)
    return jnp.take_along_axis(
        stacked, task_labels.astype(jnp.int32)[None, :, None], axis=0)[0]


# ----------------------------------------------------------------------------
# Main
# ----------------------------------------------------------------------------
if __name__ == "__main__":
    key = jax.random.PRNGKey(0)

    # Problem configuration (small, consistent with the module's forward).
    B, C, H, W = 8, 4, 16, 16             # NCHW input; B=8 matches the sublane width
    D = C * H * W                          # 1024 flattened features
    n_layers = 3
    n_tasks = 2                            # two calls to new_task()
    n_classes_per_task = [2] * n_tasks     # PnnClassifier.new_task appends 2
    sizes = [D, 128, 128, 16]              # len = n_layers + 1

    key, kx, kl, kp = jax.random.split(key, 4)
    x = jax.random.normal(kx, (B, C, H, W), dtype=jnp.float32)
    task_labels = jax.random.randint(kl, (B,), 0, n_tasks, dtype=jnp.int32)
    params = init_pnn_params(kp, n_layers, n_tasks, sizes)
    packed = pack_params(params, n_layers, n_tasks, sizes, n_classes_per_task)

    y = pnn_forward(x, task_labels, packed, n_layers, n_tasks, sizes)
    y = jax.block_until_ready(y)

    # f32 reference; kernel uses bf16 weights/activations on the MXU, so loose tolerance.
    y_ref = pnn_forward_ref(x, task_labels, params, n_layers, n_classes_per_task)
    np.testing.assert_allclose(np.asarray(y), np.asarray(y_ref), rtol=5e-2, atol=5e-2)

    assert y.shape == (B, sizes[-1]) and y.dtype == jnp.float32
    print("KERNEL_OK")
</pallas_src>

<mosaic_0001>
module attributes {stable_mosaic.version = 11 : i64} {
  func.func @kernel(%arg0: i32, %arg1: memref<8x1024xbf16, #tpu.memory_space<vmem>>, %arg2: memref<8x2xf32, #tpu.memory_space<vmem>>, %arg3: memref<1024x256xbf16, #tpu.memory_space<vmem>>, %arg4: memref<1x256xf32, #tpu.memory_space<vmem>>, %arg5: memref<1x256xf32, #tpu.memory_space<vmem>>, %arg6: memref<256x256xbf16, #tpu.memory_space<vmem>>, %arg7: memref<1x256xf32, #tpu.memory_space<vmem>>, %arg8: memref<256x256xbf16, #tpu.memory_space<vmem>>, %arg9: memref<1x256xf32, #tpu.memory_space<vmem>>, %arg10: memref<8x128xf32, #tpu.memory_space<vmem>>) attributes {dimension_semantics = [#tpu.dimension_semantics<parallel>], iteration_bounds = array<i64: 1>, scalar_prefetch = 0 : i64, scratch_operands = 0 : i64, tpu.core_type = #tpu.core_type<tc>, window_params = [{transform_indices = @transform_0, window_bounds = array<i64: 8, 1024>}, {transform_indices = @transform_1, window_bounds = array<i64: 8, 2>}, {pipeline_mode = #tpu.pipeline_mode<synchronous>, transform_indices = @transform_2, window_bounds = array<i64: 1024, 256>}, {pipeline_mode = #tpu.pipeline_mode<synchronous>, transform_indices = @transform_3, window_bounds = array<i64: 1, 256>}, {pipeline_mode = #tpu.pipeline_mode<synchronous>, transform_indices = @transform_4, window_bounds = array<i64: 1, 256>}, {pipeline_mode = #tpu.pipeline_mode<synchronous>, transform_indices = @transform_5, window_bounds = array<i64: 256, 256>}, {pipeline_mode = #tpu.pipeline_mode<synchronous>, transform_indices = @transform_6, window_bounds = array<i64: 1, 256>}, {pipeline_mode = #tpu.pipeline_mode<synchronous>, transform_indices = @transform_7, window_bounds = array<i64: 256, 256>}, {pipeline_mode = #tpu.pipeline_mode<synchronous>, transform_indices = @transform_8, window_bounds = array<i64: 1, 256>}, {transform_indices = @transform_9, window_bounds = array<i64: 8, 128>}]} {
    %c0 = arith.constant 0 : index
    %c0_0 = arith.constant 0 : index
    %0 = vector.load %arg1[%c0, %c0_0] : memref<8x1024xbf16, #tpu.memory_space<vmem>>, vector<8x1024xbf16>
    %c0_1 = arith.constant 0 : index
    %c0_2 = arith.constant 0 : index
    %1 = vector.load %arg3[%c0_1, %c0_2] : memref<1024x256xbf16, #tpu.memory_space<vmem>>, vector<1024x256xbf16>
    %cst = arith.constant dense<0.000000e+00> : vector<8x256xf32>
    %2 = tpu.matmul %0, %1, %cst {dimension_numbers = #tpu.dot_dimension_numbers<[1], [0], [0], [1], [0, 0, 1, 1], [], []>} : vector<8x1024xbf16>, vector<1024x256xbf16>, vector<8x256xf32> -> vector<8x256xf32>
    %c0_3 = arith.constant 0 : index
    %c0_4 = arith.constant 0 : index
    %3 = vector.load %arg4[%c0_3, %c0_4] : memref<1x256xf32, #tpu.memory_space<vmem>>, vector<1x256xf32>
    %4 = vector.broadcast %3 : vector<1x256xf32> to vector<8x256xf32>
    %5 = arith.addf %2, %4 : vector<8x256xf32>
    %cst_5 = arith.constant 0.000000e+00 : f32
    %6 = vector.broadcast %cst_5 : f32 to vector<8x256xf32>
    %7 = arith.maximumf %5, %6 : vector<8x256xf32>
    %c0_6 = arith.constant 0 : index
    %c0_7 = arith.constant 0 : index
    %8 = vector.load %arg5[%c0_6, %c0_7] : memref<1x256xf32, #tpu.memory_space<vmem>>, vector<1x256xf32>
    %9 = vector.broadcast %8 : vector<1x256xf32> to vector<8x256xf32>
    %10 = arith.addf %7, %9 : vector<8x256xf32>
    %11 = arith.truncf %10 : vector<8x256xf32> to vector<8x256xbf16>
    %c0_8 = arith.constant 0 : index
    %c0_9 = arith.constant 0 : index
    %12 = vector.load %arg6[%c0_8, %c0_9] : memref<256x256xbf16, #tpu.memory_space<vmem>>, vector<256x256xbf16>
    %cst_10 = arith.constant dense<0.000000e+00> : vector<8x256xf32>
    %13 = tpu.matmul %11, %12, %cst_10 {dimension_numbers = #tpu.dot_dimension_numbers<[1], [0], [0], [1], [0, 0, 1, 1], [], []>} : vector<8x256xbf16>, vector<256x256xbf16>, vector<8x256xf32> -> vector<8x256xf32>
    %c0_11 = arith.constant 0 : index
    %c0_12 = arith.constant 0 : index
    %14 = vector.load %arg7[%c0_11, %c0_12] : memref<1x256xf32, #tpu.memory_space<vmem>>, vector<1x256xf32>
    %15 = vector.broadcast %14 : vector<1x256xf32> to vector<8x256xf32>
    %16 = arith.addf %13, %15 : vector<8x256xf32>
    %cst_13 = arith.constant 0.000000e+00 : f32
    %17 = vector.broadcast %cst_13 : f32 to vector<8x256xf32>
    %18 = arith.maximumf %16, %17 : vector<8x256xf32>
    %19 = arith.truncf %18 : vector<8x256xf32> to vector<8x256xbf16>
    %c0_14 = arith.constant 0 : index
    %c0_15 = arith.constant 0 : index
    %20 = vector.load %arg8[%c0_14, %c0_15] : memref<256x256xbf16, #tpu.memory_space<vmem>>, vector<256x256xbf16>
    %cst_16 = arith.constant dense<0.000000e+00> : vector<8x256xf32>
    %21 = tpu.matmul %19, %20, %cst_16 {dimension_numbers = #tpu.dot_dimension_numbers<[1], [0], [0], [1], [0, 0, 1, 1], [], []>} : vector<8x256xbf16>, vector<256x256xbf16>, vector<8x256xf32> -> vector<8x256xf32>
    %c0_17 = arith.constant 0 : index
    %c0_18 = arith.constant 0 : index
    %22 = vector.load %arg9[%c0_17, %c0_18] : memref<1x256xf32, #tpu.memory_space<vmem>>, vector<1x256xf32>
    %23 = vector.broadcast %22 : vector<1x256xf32> to vector<8x256xf32>
    %24 = arith.addf %21, %23 : vector<8x256xf32>
    %cst_19 = arith.constant 0.000000e+00 : f32
    %25 = vector.broadcast %cst_19 : f32 to vector<8x256xf32>
    %26 = arith.maximumf %24, %25 : vector<8x256xf32>
    %c0_20 = arith.constant 0 : index
    %c0_21 = arith.constant 0 : index
    %27 = vector.load %arg2[%c0_20, %c0_21] : memref<8x2xf32, #tpu.memory_space<vmem>>, vector<8x2xf32>
    %28 = vector.extract_strided_slice %27 {offsets = [0, 0], sizes = [8, 1], strides = [1, 1]} : vector<8x2xf32> to vector<8x1xf32>
    %29 = vector.extract_strided_slice %26 {offsets = [0, 0], sizes = [8, 128], strides = [1, 1]} : vector<8x256xf32> to vector<8x128xf32>
    %30 = vector.broadcast %28 : vector<8x1xf32> to vector<8x128xf32>
    %31 = arith.mulf %30, %29 : vector<8x128xf32>
    %32 = vector.extract_strided_slice %27 {offsets = [0, 1], sizes = [8, 1], strides = [1, 1]} : vector<8x2xf32> to vector<8x1xf32>
    %33 = vector.extract_strided_slice %26 {offsets = [0, 128], sizes = [8, 128], strides = [1, 1]} : vector<8x256xf32> to vector<8x128xf32>
    %34 = vector.broadcast %32 : vector<8x1xf32> to vector<8x128xf32>
    %35 = arith.mulf %34, %33 : vector<8x128xf32>
    %36 = arith.addf %31, %35 : vector<8x128xf32>
    %c0_22 = arith.constant 0 : index
    %c0_23 = arith.constant 0 : index
    %37 = vector.load %arg10[%c0_22, %c0_23] : memref<8x128xf32, #tpu.memory_space<vmem>>, vector<8x128xf32>
    tpu.vector_store %arg10[%c0_22, %c0_23], %36 {strides = array<i32>} : memref<8x128xf32, #tpu.memory_space<vmem>>, vector<8x128xf32>,
    return
  }
  func.func @transform_0(%arg0: i32) -> (i32, i32) {
    %c0_i32 = arith.constant 0 : i32
    %c0_i32_0 = arith.constant 0 : i32
    return %arg0, %c0_i32 : i32, i32
  }
  func.func @transform_1(%arg0: i32) -> (i32, i32) {
    %c0_i32 = arith.constant 0 : i32
    %c0_i32_0 = arith.constant 0 : i32
    return %arg0, %c0_i32 : i32, i32
  }
  func.func @transform_2(%arg0: i32) -> (i32, i32) {
    %c0_i32 = arith.constant 0 : i32
    %c0_i32_0 = arith.constant 0 : i32
    %c0_i32_1 = arith.constant 0 : i32
    return %c0_i32, %c0_i32_0 : i32, i32
  }
  func.func @transform_3(%arg0: i32) -> (i32, i32) {
    %c0_i32 = arith.constant 0 : i32
    %c0_i32_0 = arith.constant 0 : i32
    %c0_i32_1 = arith.constant 0 : i32
    return %c0_i32, %c0_i32_0 : i32, i32
  }
  func.func @transform_4(%arg0: i32) -> (i32, i32) {
    %c0_i32 = arith.constant 0 : i32
    %c0_i32_0 = arith.constant 0 : i32
    %c0_i32_1 = arith.constant 0 : i32
    return %c0_i32, %c0_i32_0 : i32, i32
  }
  func.func @transform_5(%arg0: i32) -> (i32, i32) {
    %c0_i32 = arith.constant 0 : i32
    %c0_i32_0 = arith.constant 0 : i32
    %c0_i32_1 = arith.constant 0 : i32
    return %c0_i32, %c0_i32_0 : i32, i32
  }
  func.func @transform_6(%arg0: i32) -> (i32, i32) {
    %c0_i32 = arith.constant 0 : i32
    %c0_i32_0 = arith.constant 0 : i32
    %c0_i32_1 = arith.constant 0 : i32
    return %c0_i32, %c0_i32_0 : i32, i32
  }
  func.func @transform_7(%arg0: i32) -> (i32, i32) {
    %c0_i32 = arith.constant 0 : i32
    %c0_i32_0 = arith.constant 0 : i32
    %c0_i32_1 = arith.constant 0 : i32
    return %c0_i32, %c0_i32_0 : i32, i32
  }
  func.func @transform_8(%arg0: i32) -> (i32, i32) {
    %c0_i32 = arith.constant 0 : i32
    %c0_i32_0 = arith.constant 0 : i32
    %c0_i32_1 = arith.constant 0 : i32
    return %c0_i32, %c0_i32_0 : i32, i32
  }
  func.func @transform_9(%arg0: i32) -> (i32, i32) {
    %c0_i32 = arith.constant 0 : i32
    %c0_i32_0 = arith.constant 0 : i32
    return %arg0, %c0_i32 : i32, i32
  }
}

</mosaic_0001>

<bundles_post_ra>
// kernel: tpu_custom_call.1
= control target key start
LH: loop header
LB: loop body
LE: loop exit
PB: predicated region body
PF: predicated region fallthrough
CT: control target
= control target key end

     0   :  { %14 = vsyncpa [#allocation3], 0  ;;  %s2890_s0 = inlined_call_operand.hbm [shape: bf16[8,1024], index: 0, kind: input, shape index: {}]   ;;  %s2891_s1 = inlined_call_operand.vmem [shape: f32[8,2], index: 1, kind: input, shape index: {}]   ;;  %s2892_s2 = inlined_call_operand.hbm [shape: bf16[1024,256], index: 2, kind: input, shape index: {}]   ;;  %s2893_s3 = inlined_call_operand.vmem [shape: f32[1,256], index: 3, kind: input, shape index: {}]   ;;  %s2894_s4 = inlined_call_operand.vmem [shape: f32[1,256], index: 4, kind: input, shape index: {}]   ;;  %s2895_s5 = inlined_call_operand.hbm [shape: bf16[256,256], index: 5, kind: input, shape index: {}]   ;;  %s2896_s6 = inlined_call_operand.vmem [shape: f32[1,256], index: 6, kind: input, shape index: {}]   ;;  %s2897_s7 = inlined_call_operand.hbm [shape: bf16[256,256], index: 7, kind: input, shape index: {}]   ;;  %s2898_s8 = inlined_call_operand.vmem [shape: f32[1,256], index: 8, kind: input, shape index: {}]   ;;  %s2899_s9 = inlined_call_operand.hbm [shape: f32[8,128], index: 9, kind: output, shape index: {}]  }
   0x1   :  { %15 = vsyncpa [#allocation6], 0 }
   0x2   :  { %16 = vsyncpa [#allocation9], 0  ;;  %s35_s11 = sshll.u32 %s2892_s2, 4  ;;  %s36_s11 = int_to_ptr.hbm [resolvable:$true] %s35_s11 }
   0x3   :  { %17 = vsyncpa [#allocation4], 0  ;;  %s2758_s12 = smov [#allocation5]   ;;  %s23_s16 = sshll.u32 %s2890_s0, 4  ;;  %s24_s16 = int_to_ptr.hbm [resolvable:$true] %s23_s16 }
   0x4   :  { %s37_s13 = sshll.u32 %s2758_s12, 4  ;;  %s2759_s17 = smov 128   ;;  %s38_s13 = int_to_ptr.vmem [resolvable:$true] %s37_s13 }
   0x5   :  { %s2760_s18 = smov 8   ;;  %s2761_s19 = smov [#allocation2]  }
   0x6   :  { %43 = dma.hbm_to_vmem [thread:$0]  %s36_s11, 16384, %s38_s13, [#allocation6], %s2759_s17, %s2759_s17, %s2760_s18  }
   0x7   :  { %s25_s20 = sshll.u32 %s2761_s19, 4  ;;  %s52_s23 = sshll.u32 %s2895_s5, 4  ;;  %s26_s20 = int_to_ptr.vmem [resolvable:$true] %s25_s20  ;;  %s53_s23 = int_to_ptr.hbm [resolvable:$true] %s52_s23 }
   0x8   :  { %28 = dma.hbm_to_vmem [thread:$0]  %s24_s16, 512, %s26_s20, [#allocation3]  }
   0x9   :  { %s67_s25 = sshll.u32 %s2897_s7, 4  ;;  %s2762_s26 = smov [#allocation7]   ;;  %s68_s25 = int_to_ptr.hbm [resolvable:$true] %s67_s25 }
   0xa   :  { %s54_s27 = sshll.u32 %s2762_s26, 4  ;;  %s2763_s0 = smov [#allocation8]   ;;  %s55_s27 = int_to_ptr.vmem [resolvable:$true] %s54_s27 }
   0xb   :  { %60 = dma.hbm_to_vmem [thread:$0]  %s53_s23, 4096, %s55_s27, [#allocation6], %s2759_s17, %s2759_s17, %s2760_s18  }
   0xc   :  { %s69_s28 = sshll.u32 %s2763_s0, 4  ;;  %s70_s28 = int_to_ptr.vmem [resolvable:$true] %s69_s28 }
   0xd   :  { %75 = dma.hbm_to_vmem [thread:$0]  %s68_s25, 4096, %s70_s28, [#allocation9], %s2759_s17, %s2759_s17, %s2760_s18  }
   0xe   :  { %2750 = dma.done.wait [#allocation3], 512  }
   0xf   :  { %2751 = vsyncadd [#allocation3], 4294966784 }
  0x10   :  { %2752 = dma.done.wait [#allocation6], 20480  }
  0x11   :  { %2753 = vsyncadd [#allocation6], 4294946816 }
  0x12   :  { %2754 = dma.done.wait [#allocation9], 4096  }
  0x13   :  { %2755 = vsyncadd [#allocation9], 4294963200  ;;  %v1717_v0 = vld [vmem:[#allocation5 + $0x70] sm:$0xf]  ;;  %v2442_v1 = vld [vmem:[#allocation5 + $0x74] sm:$0xf0] }
  0x14   :  { %v1781_v2 = vld [vmem:[#allocation5 + $0xf0] sm:$0xf]  ;;  %v1718_v3 = vor.u32 %v2442_v1, %v1717_v0  ;;  %v2458_v4 = vld [vmem:[#allocation5 + $0xf4] sm:$0xf0]  ;;  %v1709_v11 = vld [vmem:[#allocation5 + $0x60] sm:$0xf] }
  0x15   :  { %v1845_v5 = vld [vmem:[#allocation5 + $0x170] sm:$0xf]  ;;  %v2474_v6 = vld [vmem:[#allocation5 + $0x174] sm:$0xf0]  ;;  %v1782_v7 = vor.u32 %v2458_v4, %v1781_v2  ;;  %v2440_v13 = vld [vmem:[#allocation5 + $0x64] sm:$0xf0] }
  0x16   :  { %v1846_v8 = vor.u32 %v2474_v6, %v1845_v5  ;;  %v1909_v9 = vld [vmem:[#allocation5 + $0x1f0] sm:$0xf]  ;;  %v2490_v10 = vld [vmem:[#allocation5 + $0x1f4] sm:$0xf0]  ;;  %900 = vmatpush.bf16.msra.mxu0 %v1718_v3  ;;  %v1773_v14 = vld [vmem:[#allocation5 + $0xe0] sm:$0xf]  ;;  %v1710_v16 = vor.u32 %v2440_v13, %v1709_v11 }
  0x17   :  { %v1910_v12 = vor.u32 %v2490_v10, %v1909_v9  ;;  %v2456_v15 = vld [vmem:[#allocation5 + $0xe4] sm:$0xf0]  ;;  %913 = vmatpush.bf16.msra.mxu1 %v1782_v7  ;;  %v1837_v18 = vld [vmem:[#allocation5 + $0x160] sm:$0xf]  ;;  %v1701_v23 = vld [vmem:[#allocation5 + $0x50] sm:$0xf] }
  0x18   :  { %926 = vmatpush.bf16.msra.mxu2 %v1846_v8  ;;  %v1774_v17 = vor.u32 %v2456_v15, %v1773_v14  ;;  %v2472_v19 = vld [vmem:[#allocation5 + $0x164] sm:$0xf0]  ;;  %v1901_v20 = vld [vmem:[#allocation5 + $0x1e0] sm:$0xf]  ;;  %v2438_v24 = vld [vmem:[#allocation5 + $0x54] sm:$0xf0] }
  0x19   :  { %939 = vmatpush.bf16.msra.mxu3 %v1910_v12  ;;  %v1838_v21 = vor.u32 %v2472_v19, %v1837_v18  ;;  %v2488_v22 = vld [vmem:[#allocation5 + $0x1e4] sm:$0xf0]  ;;  %v1765_v26 = vld [vmem:[#allocation5 + $0xd0] sm:$0xf]  ;;  %v2454_v27 = vld [vmem:[#allocation5 + $0xd4] sm:$0xf0]  ;;  %v1702_v29 = vor.u32 %v2438_v24, %v1701_v23 }
  0x1a   :  { %v1902_v25 = vor.u32 %v2488_v22, %v1901_v20  ;;  %v1829_v28 = vld [vmem:[#allocation5 + $0x150] sm:$0xf]  ;;  %901 = vmatpush.bf16.msra.mxu0 %v1710_v16  ;;  %v2470_v30 = vld [vmem:[#allocation5 + $0x154] sm:$0xf0]  ;;  %v1766_v33 = vor.u32 %v2454_v27, %v1765_v26  ;;  %v1693_v35 = vld [vmem:[#allocation5 + $0x40] sm:$0xf] }
  0x1b   :  { %v1893_v31 = vld [vmem:[#allocation5 + $0x1d0] sm:$0xf]  ;;  %v2486_v32 = vld [vmem:[#allocation5 + $0x1d4] sm:$0xf0]  ;;  %914 = vmatpush.bf16.msra.mxu1 %v1774_v17  ;;  %v1830_v34 = vor.u32 %v2470_v30, %v1829_v28  ;;  %v2436_v36 = vld [vmem:[#allocation5 + $0x44] sm:$0xf0] }
  0x1c   :  { %927 = vmatpush.bf16.msra.mxu2 %v1838_v21  ;;  %v1757_v37 = vld [vmem:[#allocation5 + $0xc0] sm:$0xf]  ;;  %v1894_v38 = vor.u32 %v2486_v32, %v1893_v31  ;;  %v2452_v39 = vld [vmem:[#allocation5 + $0xc4] sm:$0xf0]  ;;  %v1694_v44 = vor.u32 %v2436_v36, %v1693_v35  ;;  %v1685_v47 = vld [vmem:[#allocation5 + $0x30] sm:$0xf] }
  0x1d   :  { %940 = vmatpush.bf16.msra.mxu3 %v1902_v25  ;;  %v1821_v40 = vld [vmem:[#allocation5 + $0x140] sm:$0xf]  ;;  %v2468_v41 = vld [vmem:[#allocation5 + $0x144] sm:$0xf0]  ;;  %v1758_v45 = vor.u32 %v2452_v39, %v1757_v37  ;;  %v2434_v48 = vld [vmem:[#allocation5 + $0x34] sm:$0xf0] }
  0x1e   :  { %v1885_v42 = vld [vmem:[#allocation5 + $0x1c0] sm:$0xf]  ;;  %v2484_v43 = vld [vmem:[#allocation5 + $0x1c4] sm:$0xf0]  ;;  %902 = vmatpush.bf16.msra.mxu0 %v1702_v29  ;;  %v1822_v46 = vor.u32 %v2468_v41, %v1821_v40  ;;  %v1749_v49 = vld [vmem:[#allocation5 + $0xb0] sm:$0xf]  ;;  %v1686_v56 = vor.u32 %v2434_v48, %v1685_v47 }
  0x1f   :  { %915 = vmatpush.bf16.msra.mxu1 %v1766_v33  ;;  %v1886_v50 = vor.u32 %v2484_v43, %v1885_v42  ;;  %v2450_v51 = vld [vmem:[#allocation5 + $0xb4] sm:$0xf0]  ;;  %v1813_v52 = vld [vmem:[#allocation5 + $0x130] sm:$0xf]  ;;  %v1677_v59 = vld [vmem:[#allocation5 + $0x20] sm:$0xf] }
  0x20   :  { %928 = vmatpush.bf16.msra.mxu2 %v1830_v34  ;;  %v2466_v53 = vld [vmem:[#allocation5 + $0x134] sm:$0xf0]  ;;  %v1877_v54 = vld [vmem:[#allocation5 + $0x1b0] sm:$0xf]  ;;  %v1750_v57 = vor.u32 %v2450_v51, %v1749_v49  ;;  %v2432_v60 = vld [vmem:[#allocation5 + $0x24] sm:$0xf0] }
  0x21   :  { %941 = vmatpush.bf16.msra.mxu3 %v1894_v38  ;;  %v2482_v55 = vld [vmem:[#allocation5 + $0x1b4] sm:$0xf0]  ;;  %v1814_v58 = vor.u32 %v2466_v53, %v1813_v52  ;;  %v1741_v61 = vld [vmem:[#allocation5 + $0xa0] sm:$0xf]  ;;  %v2448_v63 = vld [vmem:[#allocation5 + $0xa4] sm:$0xf0]  ;;  %v1678_v4 = vor.u32 %v2432_v60, %v1677_v59 }
  0x22   :  { %903 = vmatpush.bf16.msra.mxu0 %v1694_v44  ;;  %v1878_v62 = vor.u32 %v2482_v55, %v1877_v54  ;;  %v1805_v0 = vld [vmem:[#allocation5 + $0x120] sm:$0xf]  ;;  %v2464_v1 = vld [vmem:[#allocation5 + $0x124] sm:$0xf0]  ;;  %v1742_v5 = vor.u32 %v2448_v63, %v1741_v61  ;;  %v1669_v7 = vld [vmem:[#allocation5 + $0x10] sm:$0xf] }
  0x23   :  { %916 = vmatpush.bf16.msra.mxu1 %v1758_v45  ;;  %v1869_v2 = vld [vmem:[#allocation5 + $0x1a0] sm:$0xf]  ;;  %v2480_v3 = vld [vmem:[#allocation5 + $0x1a4] sm:$0xf0]  ;;  %v1806_v6 = vor.u32 %v2464_v1, %v1805_v0  ;;  %v2430_v8 = vld [vmem:[#allocation5 + $0x14] sm:$0xf0] }
  0x24   :  { %929 = vmatpush.bf16.msra.mxu2 %v1822_v46  ;;  %v1733_v9 = vld [vmem:[#allocation5 + $0x90] sm:$0xf]  ;;  %v1870_v10 = vor.u32 %v2480_v3, %v1869_v2  ;;  %v2446_v11 = vld [vmem:[#allocation5 + $0x94] sm:$0xf0]  ;;  %v1670_v16 = vor.u32 %v2430_v8, %v1669_v7  ;;  %v1661_v17 = vld [vmem:[#allocation5] sm:$0xf] }
  0x25   :  { %942 = vmatpush.bf16.msra.mxu3 %v1886_v50  ;;  %v1797_v12 = vld [vmem:[#allocation5 + $0x110] sm:$0xf]  ;;  %v2462_v13 = vld [vmem:[#allocation5 + $0x114] sm:$0xf0]  ;;  %v2428_v18 = vld [vmem:[#allocation5 + $0x4] sm:$0xf0]  ;;  %v1734_v19 = vor.u32 %v2446_v11, %v1733_v9 }
  0x26   :  { %904 = vmatpush.bf16.msra.mxu0 %v1686_v56  ;;  %v1861_v14 = vld [vmem:[#allocation5 + $0x190] sm:$0xf]  ;;  %v2478_v15 = vld [vmem:[#allocation5 + $0x194] sm:$0xf0]  ;;  %v1798_v20 = vor.u32 %v2462_v13, %v1797_v12  ;;  %v1725_v21 = vld [vmem:[#allocation5 + $0x80] sm:$0xf]  ;;  %v1662_v31 = vor.u32 %v2428_v18, %v1661_v17 }
  0x27   :  { %917 = vmatpush.bf16.msra.mxu1 %v1750_v57  ;;  %v2444_v22 = vld [vmem:[#allocation5 + $0x84] sm:$0xf0]  ;;  %v1789_v23 = vld [vmem:[#allocation5 + $0x100] sm:$0xf]  ;;  %v1862_v24 = vor.u32 %v2478_v15, %v1861_v14  ;;  %v1973_v28 = vld [vmem:[#allocation5 + $0x270] sm:$0xf] }
  0x28   :  { %930 = vmatpush.bf16.msra.mxu2 %v1814_v58  ;;  %v2460_v25 = vld [vmem:[#allocation5 + $0x104] sm:$0xf0]  ;;  %v1853_v26 = vld [vmem:[#allocation5 + $0x180] sm:$0xf]  ;;  %v2506_v29 = vld [vmem:[#allocation5 + $0x274] sm:$0xf0]  ;;  %v1726_v35 = vor.u32 %v2444_v22, %v1725_v21 }
  0x29   :  { %943 = vmatpush.bf16.msra.mxu3 %v1878_v62  ;;  %v2476_v27 = vld [vmem:[#allocation5 + $0x184] sm:$0xf0]  ;;  %v2037_v30 = vld [vmem:[#allocation5 + $0x2f0] sm:$0xf]  ;;  %v2522_v32 = vld [vmem:[#allocation5 + $0x2f4] sm:$0xf0]  ;;  %v1790_v36 = vor.u32 %v2460_v25, %v1789_v23  ;;  %v1974_v40 = vor.u32 %v2506_v29, %v1973_v28 }
  0x2a   :  { %905 = vmatpush.bf16.msra.mxu0 %v1678_v4  ;;  %v2101_v33 = vld [vmem:[#allocation5 + $0x370] sm:$0xf]  ;;  %v2538_v34 = vld [vmem:[#allocation5 + $0x374] sm:$0xf0]  ;;  %v1854_v39 = vor.u32 %v2476_v27, %v1853_v26  ;;  %v2038_v41 = vor.u32 %v2522_v32, %v2037_v30  ;;  %v1965_v43 = vld [vmem:[#allocation5 + $0x260] sm:$0xf] }
  0x2b   :  { %918 = vmatpush.bf16.msra.mxu1 %v1742_v5  ;;  %v2165_v37 = vld [vmem:[#allocation5 + $0x3f0] sm:$0xf]  ;;  %v2554_v38 = vld [vmem:[#allocation5 + $0x3f4] sm:$0xf0]  ;;  %v2102_v42 = vor.u32 %v2538_v34, %v2101_v33  ;;  %v2504_v44 = vld [vmem:[#allocation5 + $0x264] sm:$0xf0] }
  0x2c   :  { %931 = vmatpush.bf16.msra.mxu2 %v1806_v6  ;;  %v2029_v45 = vld [vmem:[#allocation5 + $0x2e0] sm:$0xf]  ;;  %v2166_v46 = vor.u32 %v2554_v38, %v2165_v37  ;;  %v2520_v47 = vld [vmem:[#allocation5 + $0x2e4] sm:$0xf0]  ;;  %v1966_v53 = vor.u32 %v2504_v44, %v1965_v43  ;;  %v1957_v54 = vld [vmem:[#allocation5 + $0x250] sm:$0xf] }
  0x2d   :  { %944 = vmatpush.bf16.msra.mxu3 %v1870_v10  ;;  %v2093_v48 = vld [vmem:[#allocation5 + $0x360] sm:$0xf]  ;;  %v2536_v49 = vld [vmem:[#allocation5 + $0x364] sm:$0xf0]  ;;  %v2030_v57 = vor.u32 %v2520_v47, %v2029_v45  ;;  %v2502_v59 = vld [vmem:[#allocation5 + $0x254] sm:$0xf0] }
  0x2e   :  { %906 = vmatpush.bf16.msra.mxu0 %v1670_v16  ;;  %v2157_v50 = vld [vmem:[#allocation5 + $0x3e0] sm:$0xf]  ;;  %v2552_v51 = vld [vmem:[#allocation5 + $0x3e4] sm:$0xf0]  ;;  %v2094_v58 = vor.u32 %v2536_v49, %v2093_v48  ;;  %v2021_v60 = vld [vmem:[#allocation5 + $0x2d0] sm:$0xf]  ;;  %v1958_v8 = vor.u32 %v2502_v59, %v1957_v54 }
  0x2f   :  { %919 = vmatpush.bf16.msra.mxu1 %v1734_v19  ;;  %v95_v52 = vld [vmem:[#allocation2 + $0x8] sm:$0xff]  ;;  %v2518_v61 = vld [vmem:[#allocation5 + $0x2d4] sm:$0xf0]  ;;  %v2158_v62 = vor.u32 %v2552_v51, %v2157_v50  ;;  %v2085_v63 = vld [vmem:[#allocation5 + $0x350] sm:$0xf]  ;;  %s2766_s12 = smov [#allocation10]  }
  0x30   :  { %932 = vmatpush.bf16.msra.mxu2 %v1798_v20  ;;  %v238_v55 = vunpack.c.l.b16 %v95_v52  ;;  %v239_v56 = vunpack.c.h.b16 %v95_v52  ;;  %v2534_v0 = vld [vmem:[#allocation5 + $0x354] sm:$0xf0]  ;;  %v94_v2 = vld [vmem:[#allocation2] sm:$0xff]  ;;  %v2149_v3 = vld [vmem:[#allocation5 + $0x3d0] sm:$0xf]  ;;  %v2022_v9 = vor.u32 %v2518_v61, %v2021_v60  ;;  %s1645_s13 = sshll.u32 %s2766_s12, 4  ;;  %s1646_s13 = int_to_ptr.vmem [resolvable:$true] %s1645_s13 }
  0x31   :  { %945 = vmatpush.bf16.msra.mxu3 %v1862_v24  ;;  %v2550_v4 = vld [vmem:[#allocation5 + $0x3d4] sm:$0xf0]  ;;  %v236_v5 = vunpack.c.l.b16 %v94_v2  ;;  %v237_v7 = vunpack.c.h.b16 %v94_v2  ;;  %v2086_v10 = vor.u32 %v2534_v0, %v2085_v63  ;;  %v1949_v11 = vld [vmem:[#allocation5 + $0x240] sm:$0xf]  ;;  %v2500_v12 = vld [vmem:[#allocation5 + $0x244] sm:$0xf0] }
  0x32   :  { %907 = vmatpush.bf16.msra.mxu0 %v1662_v31  ;;  %v2829_v1 = vpack.c.b16 %v238_v55, %v238_v55  ;;  %v2831_v6 = vpack.c.b16 %v239_v56, %v239_v56  ;;  %v2013_v13 = vld [vmem:[#allocation5 + $0x2c0] sm:$0xf]  ;;  %v2150_v16 = vor.u32 %v2550_v4, %v2149_v3  ;;  %v2516_v17 = vld [vmem:[#allocation5 + $0x2c4] sm:$0xf0]  ;;  %v1950_v22 = vor.u32 %v2500_v12, %v1949_v11  ;;  %v1941_v25 = vld [vmem:[#allocation5 + $0x230] sm:$0xf] }
  0x33   :  { %920 = vmatpush.bf16.msra.mxu1 %v1726_v35  ;;  %v2834_v14 = vpack.c.b16 %v236_v5, %v236_v5  ;;  %v2836_v15 = vpack.c.b16 %v237_v7, %v237_v7  ;;  %v2077_v18 = vld [vmem:[#allocation5 + $0x340] sm:$0xf]  ;;  %v2532_v19 = vld [vmem:[#allocation5 + $0x344] sm:$0xf0]  ;;  %v2014_v23 = vor.u32 %v2516_v17, %v2013_v13  ;;  %v2498_v26 = vld [vmem:[#allocation5 + $0x234] sm:$0xf0] }
  0x34   :  { %933 = vmatpush.bf16.msra.mxu2 %v1790_v36  ;;  %v2141_v20 = vld [vmem:[#allocation5 + $0x3c0] sm:$0xf]  ;;  %v2548_v21 = vld [vmem:[#allocation5 + $0x3c4] sm:$0xf0]  ;;  %v2078_v24 = vor.u32 %v2532_v19, %v2077_v18  ;;  %v2005_v27 = vld [vmem:[#allocation5 + $0x2b0] sm:$0xf]  ;;  %v1942_v34 = vor.u32 %v2498_v26, %v1941_v25 }
  0x35   :  { %946 = vmatpush.bf16.msra.mxu3 %v1854_v39  ;;  %908 = vmatmul.bf16.vlgmr.msra.gmra.mxu0 %v2834_v14  ;;  %v2142_v28 = vor.u32 %v2548_v21, %v2141_v20  ;;  %v2514_v29 = vld [vmem:[#allocation5 + $0x2b4] sm:$0xf0]  ;;  %v2069_v30 = vld [vmem:[#allocation5 + $0x330] sm:$0xf]  ;;  %v1933_v37 = vld [vmem:[#allocation5 + $0x220] sm:$0xf] }
  0x36   :  { %952 = vmatpush.bf16.msrb.mxu0 %v1974_v40  ;;  %921 = vmatmul.bf16.vlgmr.msra.gmra.mxu1 %v2836_v15  ;;  %v2530_v31 = vld [vmem:[#allocation5 + $0x334] sm:$0xf0]  ;;  %v2133_v32 = vld [vmem:[#allocation5 + $0x3b0] sm:$0xf]  ;;  %v2006_v35 = vor.u32 %v2514_v29, %v2005_v27  ;;  %v2496_v38 = vld [vmem:[#allocation5 + $0x224] sm:$0xf0] }
  0x37   :  { %965 = vmatpush.bf16.msrb.mxu1 %v2038_v41  ;;  %934 = vmatmul.bf16.vlgmr.msra.gmra.mxu2 %v2829_v1  ;;  %v2546_v33 = vld [vmem:[#allocation5 + $0x3b4] sm:$0xf0]  ;;  %v2070_v36 = vor.u32 %v2530_v31, %v2069_v30  ;;  %v1997_v39 = vld [vmem:[#allocation5 + $0x2a0] sm:$0xf]  ;;  %v2512_v41 = vld [vmem:[#allocation5 + $0x2a4] sm:$0xf0] }
  0x38   :  { %978 = vmatpush.bf16.msrb.mxu2 %v2102_v42  ;;  %947 = vmatmul.bf16.vlgmr.msra.gmra.mxu3 %v2831_v6  ;;  %v2134_v40 = vor.u32 %v2546_v33, %v2133_v32  ;;  %v2061_v42 = vld [vmem:[#allocation5 + $0x320] sm:$0xf]  ;;  %v2528_v43 = vld [vmem:[#allocation5 + $0x324] sm:$0xf0]  ;;  %v1998_v47 = vor.u32 %v2512_v41, %v1997_v39  ;;  %v1925_v49 = vld [vmem:[#allocation5 + $0x210] sm:$0xf] }
  0x39   :  { %991 = vmatpush.bf16.msrb.mxu3 %v2166_v46  ;;  %v2125_v44 = vld [vmem:[#allocation5 + $0x3a0] sm:$0xf]  ;;  %v2544_v45 = vld [vmem:[#allocation5 + $0x3a4] sm:$0xf0]  ;;  %v1934_v46 = vor.u32 %v2496_v38, %v1933_v37  ;;  %v2062_v48 = vor.u32 %v2528_v43, %v2061_v42  ;;  %v2494_v50 = vld [vmem:[#allocation5 + $0x214] sm:$0xf0] }
  0x3a   :  { %953 = vmatpush.bf16.msrb.mxu0 %v1966_v53  ;;  %v1989_v51 = vld [vmem:[#allocation5 + $0x290] sm:$0xf]  ;;  %v2126_v52 = vor.u32 %v2544_v45, %v2125_v44  ;;  %v2510_v53 = vld [vmem:[#allocation5 + $0x294] sm:$0xf0]  ;;  %v1926_v59 = vor.u32 %v2494_v50, %v1925_v49  ;;  %v2492_v60 = vld [vmem:[#allocation5 + $0x204] sm:$0xf0] }
  0x3b   :  { %966 = vmatpush.bf16.msrb.mxu1 %v2030_v57  ;;  %v2053_v54 = vld [vmem:[#allocation5 + $0x310] sm:$0xf]  ;;  %v2526_v55 = vld [vmem:[#allocation5 + $0x314] sm:$0xf0]  ;;  %v1981_v61 = vld [vmem:[#allocation5 + $0x280] sm:$0xf]  ;;  %v1990_v63 = vor.u32 %v2510_v53, %v1989_v51 }
  0x3c   :  { %979 = vmatpush.bf16.msrb.mxu2 %v2094_v58  ;;  %v2117_v56 = vld [vmem:[#allocation5 + $0x390] sm:$0xf]  ;;  %v2542_v57 = vld [vmem:[#allocation5 + $0x394] sm:$0xf0]  ;;  %v1917_v58 = vld [vmem:[#allocation5 + $0x200] sm:$0xf]  ;;  %v2054_v0 = vor.u32 %v2526_v55, %v2053_v54 }
  0x3d   :  { %992 = vmatpush.bf16.msrb.mxu3 %v2158_v62  ;;  %v2508_v62 = vld [vmem:[#allocation5 + $0x284] sm:$0xf0]  ;;  %v2045_v2 = vld [vmem:[#allocation5 + $0x300] sm:$0xf]  ;;  %v97_v4 = vld [vmem:[#allocation2 + $0x18] sm:$0xff]  ;;  %v2118_v5 = vor.u32 %v2542_v57, %v2117_v56  ;;  %v1918_v13 = vor.u32 %v2492_v60, %v1917_v58  ;;  %s1647_s15 = sshll.u32 %s2899_s9, 4  ;;  %s1648_s15 = int_to_ptr.hbm [resolvable:$true] %s1647_s15 }
  0x3e   :  { %954 = vmatpush.bf16.msrb.mxu0 %v1958_v8  ;;  %v2524_v3 = vld [vmem:[#allocation5 + $0x304] sm:$0xf0]  ;;  %v2109_v7 = vld [vmem:[#allocation5 + $0x380] sm:$0xf]  ;;  %v1719_v11 = vld [vmem:[#allocation5 + $0x78] sm:$0xf0]  ;;  %v242_v19 = vunpack.c.l.b16 %v97_v4  ;;  %v1982_v20 = vor.u32 %v2508_v62, %v1981_v61  ;;  %v243_v25 = vunpack.c.h.b16 %v97_v4 }
  0x3f   :  { %967 = vmatpush.bf16.msrb.mxu1 %v2022_v9  ;;  %v2540_v8 = vld [vmem:[#allocation5 + $0x384] sm:$0xf0]  ;;  %v96_v9 = vld [vmem:[#allocation2 + $0x10] sm:$0xff]  ;;  %v1847_v18 = vld [vmem:[#allocation5 + $0x178] sm:$0xf0]  ;;  %v2046_v21 = vor.u32 %v2524_v3, %v2045_v2 }
  0x40   :  { %980 = vmatpush.bf16.msrb.mxu2 %v2086_v10  ;;  %v2441_v10 = vld [vmem:[#allocation5 + $0x74] sm:$0xf]  ;;  %v2110_v26 = vor.u32 %v2540_v8, %v2109_v7  ;;  %v2439_v31 = vld [vmem:[#allocation5 + $0x64] sm:$0xf]  ;;  %v1711_v32 = vld [vmem:[#allocation5 + $0x68] sm:$0xf0] }
  0x41   :  { %993 = vmatpush.bf16.msrb.mxu3 %v2150_v16  ;;  %v2457_v12 = vld [vmem:[#allocation5 + $0xf4] sm:$0xf]  ;;  %v1783_v16 = vld [vmem:[#allocation5 + $0xf8] sm:$0xf0]  ;;  %v1722_v27 = vor.u32 %v2441_v10, %v1719_v11  ;;  %v2455_v33 = vld [vmem:[#allocation5 + $0xe4] sm:$0xf]  ;;  %v1714_v43 = vor.u32 %v2439_v31, %v1711_v32 }
  0x42   :  { %955 = vmatpush.bf16.msrb.mxu0 %v1950_v22  ;;  %v2473_v17 = vld [vmem:[#allocation5 + $0x174] sm:$0xf]  ;;  %v1786_v29 = vor.u32 %v2457_v12, %v1783_v16  ;;  %v2471_v37 = vld [vmem:[#allocation5 + $0x164] sm:$0xf]  ;;  %v1839_v38 = vld [vmem:[#allocation5 + $0x168] sm:$0xf0] }
  0x43   :  { %968 = vmatpush.bf16.msrb.mxu1 %v2014_v23  ;;  %v2489_v22 = vld [vmem:[#allocation5 + $0x1f4] sm:$0xf]  ;;  %v1911_v23 = vld [vmem:[#allocation5 + $0x1f8] sm:$0xf0]  ;;  %v1850_v30 = vor.u32 %v2473_v17, %v1847_v18  ;;  %v2487_v41 = vld [vmem:[#allocation5 + $0x1e4] sm:$0xf] }
  0x44   :  { %981 = vmatpush.bf16.msrb.mxu2 %v2078_v24  ;;  %v240_v24 = vunpack.c.l.b16 %v96_v9  ;;  %v1903_v42 = vld [vmem:[#allocation5 + $0x1e8] sm:$0xf0]  ;;  %v2453_v49 = vld [vmem:[#allocation5 + $0xd4] sm:$0xf]  ;;  %v1767_v51 = vld [vmem:[#allocation5 + $0xd8] sm:$0xf0] }
  0x45   :  { %994 = vmatpush.bf16.msrb.mxu3 %v2142_v28  ;;  %v241_v28 = vunpack.c.h.b16 %v96_v9  ;;  %v1906_v50 = vor.u32 %v2487_v41, %v1903_v42  ;;  %v1831_v53 = vld [vmem:[#allocation5 + $0x158] sm:$0xf0]  ;;  %v2485_v54 = vld [vmem:[#allocation5 + $0x1d4] sm:$0xf]  ;;  %v1770_v57 = vor.u32 %v2453_v49, %v1767_v51  ;;  %v1695_v60 = vld [vmem:[#allocation5 + $0x48] sm:$0xf0] }
  0x46   :  { %956 = vmatpush.bf16.msrb.mxu0 %v1942_v34  ;;  %v1914_v34 = vor.u32 %v2489_v22, %v1911_v23  ;;  %v2843_v39 = vpack.c.b16 %v240_v24, %v240_v24  ;;  %v1895_v55 = vld [vmem:[#allocation5 + $0x1d8] sm:$0xf0]  ;;  %v2451_v61 = vld [vmem:[#allocation5 + $0xc4] sm:$0xf]  ;;  %v1823_v2 = vld [vmem:[#allocation5 + $0x148] sm:$0xf0] }
  0x47   :  { %969 = vmatpush.bf16.msrb.mxu1 %v2006_v35  ;;  %v2841_v35 = vpack.c.b16 %v242_v19, %v242_v19  ;;  %v2847_v44 = vpack.c.b16 %v241_v28, %v241_v28  ;;  %v1898_v62 = vor.u32 %v2485_v54, %v1895_v55  ;;  %v2483_v3 = vld [vmem:[#allocation5 + $0x1c4] sm:$0xf]  ;;  %v1887_v4 = vld [vmem:[#allocation5 + $0x1c8] sm:$0xf0]  ;;  %v2433_v9 = vld [vmem:[#allocation5 + $0x34] sm:$0xf] }
  0x48   :  { %982 = vmatpush.bf16.msrb.mxu2 %v2070_v36  ;;  %v1775_v36 = vld [vmem:[#allocation5 + $0xe8] sm:$0xf0]  ;;  %v1687_v10 = vld [vmem:[#allocation5 + $0x38] sm:$0xf0]  ;;  %v2449_v11 = vld [vmem:[#allocation5 + $0xb4] sm:$0xf]  ;;  %v1890_v12 = vor.u32 %v2483_v3, %v1887_v4 }
  0x49   :  { %995 = vmatpush.bf16.msrb.mxu3 %v2134_v40  ;;  %v2845_v40 = vpack.c.b16 %v243_v25, %v243_v25  ;;  %v1778_v45 = vor.u32 %v2455_v33, %v1775_v36  ;;  %v2465_v16 = vld [vmem:[#allocation5 + $0x134] sm:$0xf]  ;;  %v1815_v17 = vld [vmem:[#allocation5 + $0x138] sm:$0xf0]  ;;  %v2431_v23 = vld [vmem:[#allocation5 + $0x24] sm:$0xf] }
  0x4a   :  { %957 = vmatpush.bf16.msrb.mxu0 %v1934_v46  ;;  %v1842_v46 = vor.u32 %v2471_v37, %v1839_v38  ;;  %v2481_v18 = vld [vmem:[#allocation5 + $0x1b4] sm:$0xf]  ;;  %v1879_v19 = vld [vmem:[#allocation5 + $0x1b8] sm:$0xf0]  ;;  %v1818_v22 = vor.u32 %v2465_v16, %v1815_v17  ;;  %v1679_v24 = vld [vmem:[#allocation5 + $0x28] sm:$0xf0] }
  0x4b   :  { %970 = vmatpush.bf16.msrb.mxu1 %v1998_v47  ;;  %v2437_v47 = vld [vmem:[#allocation5 + $0x54] sm:$0xf]  ;;  %v2447_v25 = vld [vmem:[#allocation5 + $0xa4] sm:$0xf]  ;;  %v1871_v31 = vld [vmem:[#allocation5 + $0x1a8] sm:$0xf0]  ;;  %v1682_v32 = vor.u32 %v2431_v23, %v1679_v24 }
  0x4c   :  { %983 = vmatpush.bf16.msrb.mxu2 %v2062_v48  ;;  %v1703_v48 = vld [vmem:[#allocation5 + $0x58] sm:$0xf0]  ;;  %v2463_v28 = vld [vmem:[#allocation5 + $0x124] sm:$0xf]  ;;  %v2429_v36 = vld [vmem:[#allocation5 + $0x14] sm:$0xf] }
  0x4d   :  { %996 = vmatpush.bf16.msrb.mxu3 %v2126_v52  ;;  %v2469_v52 = vld [vmem:[#allocation5 + $0x154] sm:$0xf]  ;;  %v1706_v56 = vor.u32 %v2437_v47, %v1703_v48  ;;  %v1671_v37 = vld [vmem:[#allocation5 + $0x18] sm:$0xf0]  ;;  %v2427_v49 = vld [vmem:[#allocation5 + $0x4] sm:$0xf] }
  0x4e   :  { %958 = vmatpush.bf16.msrb.mxu0 %v1926_v59  ;;  %v1834_v58 = vor.u32 %v2469_v52, %v1831_v53  ;;  %v2435_v59 = vld [vmem:[#allocation5 + $0x44] sm:$0xf]  ;;  %v2445_v38 = vld [vmem:[#allocation5 + $0x94] sm:$0xf]  ;;  %v1735_v42 = vld [vmem:[#allocation5 + $0x98] sm:$0xf0]  ;;  %v1674_v48 = vor.u32 %v2429_v36, %v1671_v37 }
  0x4f   :  { %971 = vmatpush.bf16.msrb.mxu1 %v1990_v63  ;;  %v1759_v63 = vld [vmem:[#allocation5 + $0xc8] sm:$0xf0]  ;;  %v1863_v47 = vld [vmem:[#allocation5 + $0x198] sm:$0xf0]  ;;  %v1738_v51 = vor.u32 %v2445_v38, %v1735_v42  ;;  %v2443_v53 = vld [vmem:[#allocation5 + $0x84] sm:$0xf] }
  0x50   :  { %984 = vmatpush.bf16.msrb.mxu2 %v2054_v0  ;;  %v2467_v0 = vld [vmem:[#allocation5 + $0x144] sm:$0xf]  ;;  %v1762_v7 = vor.u32 %v2451_v61, %v1759_v63  ;;  %v1727_v54 = vld [vmem:[#allocation5 + $0x88] sm:$0xf0]  ;;  %v1975_v61 = vld [vmem:[#allocation5 + $0x278] sm:$0xf0] }
  0x51   :  { %997 = vmatpush.bf16.msrb.mxu3 %v2118_v5  ;;  %v1698_v5 = vor.u32 %v2435_v59, %v1695_v60  ;;  %v1826_v8 = vor.u32 %v2467_v0, %v1823_v2  ;;  %v2459_v55 = vld [vmem:[#allocation5 + $0x104] sm:$0xf]  ;;  %v1855_v59 = vld [vmem:[#allocation5 + $0x188] sm:$0xf0]  ;;  %v2505_v60 = vld [vmem:[#allocation5 + $0x274] sm:$0xf]  ;;  %v1730_v4 = vor.u32 %v2443_v53, %v1727_v54 }
  0x52   :  { %959 = vmatpush.bf16.msrb.mxu0 %v1918_v13  ;;  %v1751_v13 = vld [vmem:[#allocation5 + $0xb8] sm:$0xf0]  ;;  %v2537_v2 = vld [vmem:[#allocation5 + $0x374] sm:$0xf]  ;;  %v1967_v16 = vld [vmem:[#allocation5 + $0x268] sm:$0xf0] }
  0x53   :  { %972 = vmatpush.bf16.msrb.mxu1 %v1982_v20  ;;  %v1690_v20 = vor.u32 %v2433_v9, %v1687_v10  ;;  %v2039_v0 = vld [vmem:[#allocation5 + $0x2f8] sm:$0xf0]  ;;  %v1978_v10 = vor.u32 %v2505_v60, %v1975_v61  ;;  %v2519_v17 = vld [vmem:[#allocation5 + $0x2e4] sm:$0xf]  ;;  %v2159_v23 = vld [vmem:[#allocation5 + $0x3e8] sm:$0xf0] }
  0x54   :  { %985 = vmatpush.bf16.msrb.mxu2 %v2046_v21  ;;  %v1754_v21 = vor.u32 %v2449_v11, %v1751_v13  ;;  %v2103_v3 = vld [vmem:[#allocation5 + $0x378] sm:$0xf0]  ;;  %v2503_v13 = vld [vmem:[#allocation5 + $0x264] sm:$0xf]  ;;  %v2513_v53 = vld [vmem:[#allocation5 + $0x2b4] sm:$0xf] }
  0x55   :  { %998 = vmatpush.bf16.msrb.mxu3 %v2110_v26  ;;  %960 = vmatmul.bf16.vlgmr.msrb.gmra.mxu0 %v2843_v39  ;;  %v1882_v26 = vor.u32 %v2481_v18, %v1879_v19  ;;  %v2031_v19 = vld [vmem:[#allocation5 + $0x2e8] sm:$0xf0]  ;;  %v1970_v24 = vor.u32 %v2503_v13, %v1967_v16  ;;  %v2151_v36 = vld [vmem:[#allocation5 + $0x3d8] sm:$0xf0]  ;;  %v2499_v42 = vld [vmem:[#allocation5 + $0x244] sm:$0xf] }
  0x56   :  { %1004 = vmatpush.bf16.msra.mxu0 %v1722_v27  ;;  %973 = vmatmul.bf16.vlgmr.msrb.gmra.mxu1 %v2847_v44  ;;  %v1743_v27 = vld [vmem:[#allocation5 + $0xa8] sm:$0xf0]  ;;  %v2493_v13 = vld [vmem:[#allocation5 + $0x214] sm:$0xf]  ;;  %v1927_v16 = vld [vmem:[#allocation5 + $0x218] sm:$0xf0] }
  0x57   :  { %1017 = vmatpush.bf16.msra.mxu1 %v1786_v29  ;;  %986 = vmatmul.bf16.vlgmr.msrb.gmra.mxu2 %v2841_v35  ;;  %v1807_v29 = vld [vmem:[#allocation5 + $0x128] sm:$0xf0]  ;;  %v1746_v33 = vor.u32 %v2447_v25, %v1743_v27  ;;  %v2034_v25 = vor.u32 %v2519_v17, %v2031_v19  ;;  %v2501_v27 = vld [vmem:[#allocation5 + $0x254] sm:$0xf]  ;;  %v1991_v19 = vld [vmem:[#allocation5 + $0x298] sm:$0xf0] }
  0x58   :  { %1030 = vmatpush.bf16.msra.mxu2 %v1850_v30  ;;  %999 = vmatmul.bf16.vlgmr.msrb.gmra.mxu3 %v2845_v40  ;;  %v2479_v30 = vld [vmem:[#allocation5 + $0x1a4] sm:$0xf]  ;;  %v2509_v17 = vld [vmem:[#allocation5 + $0x294] sm:$0xf] }
  0x59   :  { %1043 = vmatpush.bf16.msra.mxu3 %v1914_v34  ;;  %v1810_v34 = vor.u32 %v2463_v28, %v1807_v29  ;;  %v1874_v41 = vor.u32 %v2479_v30, %v1871_v31  ;;  %v1959_v28 = vld [vmem:[#allocation5 + $0x258] sm:$0xf0]  ;;  %v2517_v29 = vld [vmem:[#allocation5 + $0x2d4] sm:$0xf] }
  0x5a   :  { %1005 = vmatpush.bf16.msra.mxu0 %v1714_v43  ;;  %v2461_v43 = vld [vmem:[#allocation5 + $0x114] sm:$0xf]  ;;  %v2023_v31 = vld [vmem:[#allocation5 + $0x2d8] sm:$0xf0]  ;;  %v1962_v37 = vor.u32 %v2501_v27, %v1959_v28  ;;  %v2491_v27 = vld [vmem:[#allocation5 + $0x204] sm:$0xf] }
  0x5b   :  { %1018 = vmatpush.bf16.msra.mxu1 %v1778_v45  ;;  %v1799_v45 = vld [vmem:[#allocation5 + $0x118] sm:$0xf0]  ;;  %v2026_v38 = vor.u32 %v2517_v29, %v2023_v31  ;;  %v1919_v28 = vld [vmem:[#allocation5 + $0x208] sm:$0xf0]  ;;  %v2507_v29 = vld [vmem:[#allocation5 + $0x284] sm:$0xf] }
  0x5c   :  { %1031 = vmatpush.bf16.msra.mxu2 %v1842_v46  ;;  %v2477_v46 = vld [vmem:[#allocation5 + $0x194] sm:$0xf]  ;;  %v1802_v52 = vor.u32 %v2461_v43, %v1799_v45  ;;  %v1951_v43 = vld [vmem:[#allocation5 + $0x248] sm:$0xf0] }
  0x5d   :  { %1044 = vmatpush.bf16.msra.mxu3 %v1906_v50  ;;  %v1663_v50 = vld [vmem:[#allocation5 + $0x8] sm:$0xf0] }
  0x5e   :  { %1006 = vmatpush.bf16.msra.mxu0 %v1706_v56  ;;  %v1866_v56 = vor.u32 %v2477_v46, %v1863_v47  ;;  %v1666_v63 = vor.u32 %v2427_v49, %v1663_v50  ;;  %v2015_v46 = vld [vmem:[#allocation5 + $0x2c8] sm:$0xf0]  ;;  %v2531_v47 = vld [vmem:[#allocation5 + $0x344] sm:$0xf] }
  0x5f   :  { %1019 = vmatpush.bf16.msra.mxu1 %v1770_v57  ;;  %v1791_v57 = vld [vmem:[#allocation5 + $0x108] sm:$0xf0]  ;;  %v2547_v49 = vld [vmem:[#allocation5 + $0x3c4] sm:$0xf] }
  0x60   :  { %1032 = vmatpush.bf16.msra.mxu2 %v1834_v58  ;;  %v2475_v58 = vld [vmem:[#allocation5 + $0x184] sm:$0xf]  ;;  %v1983_v31 = vld [vmem:[#allocation5 + $0x288] sm:$0xf0] }
  0x61   :  { %1045 = vmatpush.bf16.msra.mxu3 %v1898_v62  ;;  %v2521_v62 = vld [vmem:[#allocation5 + $0x2f4] sm:$0xf]  ;;  %v1858_v9 = vor.u32 %v2475_v58, %v1855_v59  ;;  %v2135_v59 = vld [vmem:[#allocation5 + $0x3b8] sm:$0xf0] }
  0x62   :  { %1007 = vmatpush.bf16.msra.mxu0 %v1698_v5  ;;  %v1794_v5 = vor.u32 %v2459_v55, %v1791_v57  ;;  %v2042_v11 = vor.u32 %v2521_v62, %v2039_v0  ;;  %v2007_v55 = vld [vmem:[#allocation5 + $0x2b8] sm:$0xf0]  ;;  %v2545_v58 = vld [vmem:[#allocation5 + $0x3b4] sm:$0xf]  ;;  %v1935_v0 = vld [vmem:[#allocation5 + $0x228] sm:$0xf0] }
  0x63   :  { %1020 = vmatpush.bf16.msra.mxu1 %v1762_v7  ;;  %v2553_v7 = vld [vmem:[#allocation5 + $0x3f4] sm:$0xf]  ;;  %v2071_v57 = vld [vmem:[#allocation5 + $0x338] sm:$0xf0]  ;;  %v2010_v61 = vor.u32 %v2513_v53, %v2007_v55  ;;  %v2564_v55 = vld [vmem:[#allocation7 + $0x44] sm:$0xf0] }
  0x64   :  { %1033 = vmatpush.bf16.msra.mxu2 %v1826_v8  ;;  %v2167_v8 = vld [vmem:[#allocation5 + $0x3f8] sm:$0xf0] }
  0x65   :  { %1046 = vmatpush.bf16.msra.mxu3 %v1890_v12  ;;  %v2106_v12 = vor.u32 %v2537_v2, %v2103_v3  ;;  %v2170_v18 = vor.u32 %v2553_v7, %v2167_v8  ;;  %v2511_v2 = vld [vmem:[#allocation5 + $0x2a4] sm:$0xf]  ;;  %v2138_v3 = vor.u32 %v2545_v58, %v2135_v59  ;;  %v2063_v7 = vld [vmem:[#allocation5 + $0x328] sm:$0xf0] }
  0x66   :  { %1008 = vmatpush.bf16.msra.mxu0 %v1690_v20  ;;  %v2535_v20 = vld [vmem:[#allocation5 + $0x364] sm:$0xf]  ;;  %v2207_v58 = vld [vmem:[#allocation7 + $0x48] sm:$0xf0] }
  0x67   :  { %1021 = vmatpush.bf16.msra.mxu1 %v1754_v21  ;;  %v2095_v21 = vld [vmem:[#allocation5 + $0x368] sm:$0xf0]  ;;  %v2543_v8 = vld [vmem:[#allocation5 + $0x3a4] sm:$0xf] }
  0x68   :  { %1034 = vmatpush.bf16.msra.mxu2 %v1818_v22  ;;  %v2551_v22 = vld [vmem:[#allocation5 + $0x3e4] sm:$0xf] }
  0x69   :  { %1047 = vmatpush.bf16.msra.mxu3 %v1882_v26  ;;  %v2098_v26 = vor.u32 %v2535_v20, %v2095_v21  ;;  %v2162_v30 = vor.u32 %v2551_v22, %v2159_v23  ;;  %v2525_v20 = vld [vmem:[#allocation5 + $0x314] sm:$0xf]  ;;  %v2055_v21 = vld [vmem:[#allocation5 + $0x318] sm:$0xf0] }
  0x6a   :  { %1009 = vmatpush.bf16.msra.mxu0 %v1682_v32  ;;  %v2533_v32 = vld [vmem:[#allocation5 + $0x354] sm:$0xf]  ;;  %v2119_v23 = vld [vmem:[#allocation5 + $0x398] sm:$0xf0] }
  0x6b   :  { %1022 = vmatpush.bf16.msra.mxu1 %v1746_v33  ;;  %v2087_v33 = vld [vmem:[#allocation5 + $0x358] sm:$0xf0]  ;;  %v2541_v22 = vld [vmem:[#allocation5 + $0x394] sm:$0xf] }
  0x6c   :  { %1035 = vmatpush.bf16.msra.mxu2 %v1810_v34  ;;  %v2549_v34 = vld [vmem:[#allocation5 + $0x3d4] sm:$0xf] }
  0x6d   :  { %1048 = vmatpush.bf16.msra.mxu3 %v1874_v41  ;;  %v2090_v41 = vor.u32 %v2533_v32, %v2087_v33  ;;  %v2154_v45 = vor.u32 %v2549_v34, %v2151_v36  ;;  %v2523_v32 = vld [vmem:[#allocation5 + $0x304] sm:$0xf]  ;;  %v2047_v33 = vld [vmem:[#allocation5 + $0x308] sm:$0xf0] }
  0x6e   :  { %1010 = vmatpush.bf16.msra.mxu0 %v1674_v48  ;;  %v2079_v48 = vld [vmem:[#allocation5 + $0x348] sm:$0xf0]  ;;  %v2539_v34 = vld [vmem:[#allocation5 + $0x384] sm:$0xf] }
  0x6f   :  { %1023 = vmatpush.bf16.msra.mxu1 %v1738_v51  ;;  %v2497_v51 = vld [vmem:[#allocation5 + $0x234] sm:$0xf]  ;;  %v2111_v36 = vld [vmem:[#allocation5 + $0x388] sm:$0xf0] }
  0x70   :  { %1036 = vmatpush.bf16.msra.mxu2 %v1802_v52  ;;  %v1943_v52 = vld [vmem:[#allocation5 + $0x238] sm:$0xf0] }
  0x71   :  { %1049 = vmatpush.bf16.msra.mxu3 %v1866_v56  ;;  %v2529_v56 = vld [vmem:[#allocation5 + $0x334] sm:$0xf]  ;;  %v1946_v60 = vor.u32 %v2497_v51, %v1943_v52  ;;  %v2566_v51 = vld [vmem:[#allocation7 + $0x54] sm:$0xf0]  ;;  %v2215_v52 = vld [vmem:[#allocation7 + $0x58] sm:$0xf0] }
  0x72   :  { %1011 = vmatpush.bf16.msra.mxu0 %v1666_v63  ;;  %v2074_v62 = vor.u32 %v2529_v56, %v2071_v57  ;;  %v2495_v63 = vld [vmem:[#allocation5 + $0x224] sm:$0xf] }
  0x73   :  { %1024 = vmatpush.bf16.msra.mxu1 %v1730_v4  ;;  %v1999_v4 = vld [vmem:[#allocation5 + $0x2a8] sm:$0xf0]  ;;  %v2563_v56 = vld [vmem:[#allocation7 + $0x44] sm:$0xf] }
  0x74   :  { %1037 = vmatpush.bf16.msra.mxu2 %v1794_v5  ;;  %v2527_v5 = vld [vmem:[#allocation5 + $0x324] sm:$0xf]  ;;  %v2210_v59 = vor.u32 %v2563_v56, %v2207_v58  ;;  %v2287_v58 = vld [vmem:[#allocation7 + $0xe8] sm:$0xf0] }
  0x75   :  { %1050 = vmatpush.bf16.msra.mxu3 %v1858_v9  ;;  %1012 = vmatmul.bf16.vlgmr.msra.gmra.mxu0 %v2834_v14  ;;  %v2143_v14 = vld [vmem:[#allocation5 + $0x3c8] sm:$0xf0] }
  0x76   :  { %1056 = vmatpush.bf16.msrb.mxu0 %v1978_v10  ;;  %1025 = vmatmul.bf16.vlgmr.msra.gmra.mxu1 %v2836_v15  ;;  %v2082_v15 = vor.u32 %v2531_v47, %v2079_v48  ;;  %v2146_v54 = vor.u32 %v2547_v49, %v2143_v14  ;;  %v2127_v9 = vld [vmem:[#allocation5 + $0x3a8] sm:$0xf0]  ;;  %v1938_v10 = vor.u32 %v2495_v63, %v1935_v0  ;;  %v2231_v47 = vld [vmem:[#allocation7 + $0x78] sm:$0xf0]  ;;  %v2221_v49 = vld [vmem:[#allocation7 + $0x60] sm:$0xf] }
  0x77   :  { %1069 = vmatpush.bf16.msrb.mxu1 %v2042_v11  ;;  %1038 = vmatmul.bf16.vlgmr.msra.gmra.mxu2 %v2829_v1  ;;  %v2515_v1 = vld [vmem:[#allocation5 + $0x2c4] sm:$0xf]  ;;  %v2002_v11 = vor.u32 %v2511_v2, %v1999_v4  ;;  %v2568_v14 = vld [vmem:[#allocation7 + $0x64] sm:$0xf0]  ;;  %v2199_v0 = vld [vmem:[#allocation7 + $0x38] sm:$0xf0] }
  0x78   :  { %1082 = vmatpush.bf16.msrb.mxu2 %v2106_v12  ;;  %1051 = vmatmul.bf16.vlgmr.msra.gmra.mxu3 %v2831_v6  ;;  %v1954_v6 = vor.u32 %v2499_v42, %v1951_v43  ;;  %v2018_v50 = vor.u32 %v2515_v1, %v2015_v46  ;;  %v2066_v12 = vor.u32 %v2527_v5, %v2063_v7  ;;  %v2229_v43 = vld [vmem:[#allocation7 + $0x70] sm:$0xf]  ;;  %v2570_v1 = vld [vmem:[#allocation7 + $0x74] sm:$0xf0]  ;;  %v2560_v4 = vld [vmem:[#allocation7 + $0x24] sm:$0xf0] }
  0x79   :  { %1095 = vmatpush.bf16.msrb.mxu3 %v2170_v18  ;;  %v2130_v18 = vor.u32 %v2543_v8, %v2127_v9  ;;  %v2114_v42 = vor.u32 %v2539_v34, %v2111_v36  ;;  %v2230_v46 = vor.u32 %v2570_v1, %v2229_v43  ;;  %v2559_v5 = vld [vmem:[#allocation7 + $0x24] sm:$0xf]  ;;  %v2191_v9 = vld [vmem:[#allocation7 + $0x28] sm:$0xf0] }
  0x7a   :  { %1057 = vmatpush.bf16.msrb.mxu0 %v1970_v24  ;;  %v1930_v24 = vor.u32 %v2493_v13, %v1927_v16  ;;  %v2181_v16 = vld [vmem:[#allocation7 + $0x10] sm:$0xf] }
  0x7b   :  { %1070 = vmatpush.bf16.msrb.mxu1 %v2034_v25  ;;  %v1994_v25 = vor.u32 %v2509_v17, %v1991_v19  ;;  %v2558_v17 = vld [vmem:[#allocation7 + $0x14] sm:$0xf0] }
  0x7c   :  { %1083 = vmatpush.bf16.msrb.mxu2 %v2098_v26  ;;  %v2058_v26 = vor.u32 %v2525_v20, %v2055_v21  ;;  %v2182_v19 = vor.u32 %v2558_v17, %v2181_v16  ;;  %v2183_v20 = vld [vmem:[#allocation7 + $0x18] sm:$0xf0]  ;;  %v2261_v16 = vld [vmem:[#allocation7 + $0xb0] sm:$0xf]  ;;  %v2578_v17 = vld [vmem:[#allocation7 + $0xb4] sm:$0xf0] }
  0x7d   :  { %1096 = vmatpush.bf16.msrb.mxu3 %v2162_v30  ;;  %v2122_v30 = vor.u32 %v2541_v22, %v2119_v23 }
  0x7e   :  { %1058 = vmatpush.bf16.msrb.mxu0 %v1962_v37  ;;  %v1922_v37 = vor.u32 %v2491_v27, %v1919_v28 }
  0x7f   :  { %1071 = vmatpush.bf16.msrb.mxu1 %v2026_v38  ;;  %v1986_v38 = vor.u32 %v2507_v29, %v1983_v31  ;;  %v2175_v29 = vld [vmem:[#allocation7 + $0x8] sm:$0xf0] }
  0x80   :  { %1084 = vmatpush.bf16.msrb.mxu2 %v2090_v41  ;;  %v2050_v41 = vor.u32 %v2523_v32, %v2047_v33 }
  0x81   :  { %1097 = vmatpush.bf16.msrb.mxu3 %v2154_v45  ;;  %v2569_v45 = vld [vmem:[#allocation7 + $0x74] sm:$0xf] }
  0x82   :  { %1059 = vmatpush.bf16.msrb.mxu0 %v1954_v6  ;;  %v2234_v48 = vor.u32 %v2569_v45, %v2231_v47  ;;  %v2567_v6 = vld [vmem:[#allocation7 + $0x64] sm:$0xf] }
  0x83   :  { %1072 = vmatpush.bf16.msrb.mxu1 %v2018_v50  ;;  %v2222_v50 = vor.u32 %v2568_v14, %v2221_v49  ;;  %v2293_v49 = vld [vmem:[#allocation7 + $0xf0] sm:$0xf]  ;;  %v2586_v14 = vld [vmem:[#allocation7 + $0xf4] sm:$0xf0] }
  0x84   :  { %1085 = vmatpush.bf16.msrb.mxu2 %v2082_v15  ;;  %v2223_v15 = vld [vmem:[#allocation7 + $0x68] sm:$0xf0] }
  0x85   :  { %1098 = vmatpush.bf16.msrb.mxu3 %v2146_v54  ;;  %v2205_v54 = vld [vmem:[#allocation7 + $0x40] sm:$0xf] }
  0x86   :  { %1060 = vmatpush.bf16.msrb.mxu0 %v1946_v60  ;;  %v2206_v57 = vor.u32 %v2564_v55, %v2205_v54  ;;  %v2197_v60 = vld [vmem:[#allocation7 + $0x30] sm:$0xf]  ;;  %v2584_v54 = vld [vmem:[#allocation7 + $0xe4] sm:$0xf0]  ;;  %v2583_v55 = vld [vmem:[#allocation7 + $0xe4] sm:$0xf] }
  0x87   :  { %1073 = vmatpush.bf16.msrb.mxu1 %v2010_v61  ;;  %v2562_v61 = vld [vmem:[#allocation7 + $0x34] sm:$0xf0] }
  0x88   :  { %1086 = vmatpush.bf16.msrb.mxu2 %v2074_v62  ;;  %v2561_v62 = vld [vmem:[#allocation7 + $0x34] sm:$0xf]  ;;  %v2198_v63 = vor.u32 %v2562_v61, %v2197_v60  ;;  %v2582_v60 = vld [vmem:[#allocation7 + $0xd4] sm:$0xf0] }
  0x89   :  { %1099 = vmatpush.bf16.msrb.mxu3 %v2138_v3  ;;  %v2202_v2 = vor.u32 %v2561_v62, %v2199_v0  ;;  %v2189_v3 = vld [vmem:[#allocation7 + $0x20] sm:$0xf]  ;;  %v2290_v62 = vor.u32 %v2583_v55, %v2287_v58  ;;  %v2279_v0 = vld [vmem:[#allocation7 + $0xd8] sm:$0xf0] }
  0x8a   :  { %1061 = vmatpush.bf16.msrb.mxu0 %v1938_v10  ;;  %v2190_v8 = vor.u32 %v2560_v4, %v2189_v3 }
  0x8b   :  { %1074 = vmatpush.bf16.msrb.mxu1 %v2002_v11  ;;  %v2194_v11 = vor.u32 %v2559_v5, %v2191_v9  ;;  %v2579_v9 = vld [vmem:[#allocation7 + $0xc4] sm:$0xf] }
  0x8c   :  { %1087 = vmatpush.bf16.msrb.mxu2 %v2066_v12  ;;  %v2864_v12 = vld [vmem:[%s2893_s3] sm:$0x3] }
  0x8d   :  { %1100 = vmatpush.bf16.msrb.mxu3 %v2130_v18  ;;  %v2557_v18 = vld [vmem:[#allocation7 + $0x14] sm:$0xf]  ;;  %v228_v22 = vperm.slane %v2864_v12, 0 }
  0x8e   :  { %1062 = vmatpush.bf16.msrb.mxu0 %v1930_v24  ;;  %v2186_v21 = vor.u32 %v2557_v18, %v2183_v20  ;;  %v2173_v24 = vld [vmem:[#allocation7] sm:$0xf]  ;;  %v2577_v18 = vld [vmem:[#allocation7 + $0xb4] sm:$0xf]  ;;  %v2263_v20 = vld [vmem:[#allocation7 + $0xb8] sm:$0xf0] }
  0x8f   :  { %1075 = vmatpush.bf16.msrb.mxu1 %v1994_v25  ;;  %v2556_v25 = vld [vmem:[#allocation7 + $0x4] sm:$0xf0] }
  0x90   :  { %1088 = vmatpush.bf16.msrb.mxu2 %v2058_v26  ;;  %v2555_v26 = vld [vmem:[#allocation7 + $0x4] sm:$0xf]  ;;  %v2174_v28 = vor.u32 %v2556_v25, %v2173_v24  ;;  %v2253_v24 = vld [vmem:[#allocation7 + $0xa0] sm:$0xf]  ;;  %v2576_v25 = vld [vmem:[#allocation7 + $0xa4] sm:$0xf0] }
  0x91   :  { %1101 = vmatpush.bf16.msrb.mxu3 %v2122_v30  ;;  %v2178_v31 = vor.u32 %v2555_v26, %v2175_v29  ;;  %v2575_v26 = vld [vmem:[#allocation7 + $0xa4] sm:$0xf] }
  0x92   :  { %1063 = vmatpush.bf16.msrb.mxu0 %v1922_v37 }
  0x93   :  { %1076 = vmatpush.bf16.msrb.mxu1 %v1986_v38 }
  0x94   :  { %1089 = vmatpush.bf16.msrb.mxu2 %v2050_v41 }
  0x95   :  { %1102 = vmatpush.bf16.msrb.mxu3 %v2114_v42  ;;  %1064 = vmatmul.bf16.vlgmr.msrb.gmra.mxu0 %v2843_v39  ;;  %v2226_v39 = vor.u32 %v2567_v6, %v2223_v15  ;;  %v2585_v6 = vld [vmem:[#allocation7 + $0xf4] sm:$0xf]  ;;  %v2295_v15 = vld [vmem:[#allocation7 + $0xf8] sm:$0xf0] }
  0x96   :  { %1077 = vmatmul.bf16.vlgmr.msrb.gmra.mxu1 %v2847_v44  ;;  %1318 = vmatpush.bf16.msra.mxu0 %v2230_v46  ;;  %v2213_v44 = vld [vmem:[#allocation7 + $0x50] sm:$0xf]  ;;  %v2870_v46 = vld [vmem:[%s2894_s4] sm:$0x3] }
  0x97   :  { %1090 = vmatmul.bf16.vlgmr.msrb.gmra.mxu2 %v2841_v35  ;;  %v2565_v35 = vld [vmem:[#allocation7 + $0x54] sm:$0xf] }
  0x98   :  { %1103 = vmatmul.bf16.vlgmr.msrb.gmra.mxu3 %v2845_v40  ;;  %1344 = vmatpush.bf16.msra.mxu2 %v2234_v48  ;;  %v2214_v40 = vor.u32 %v2566_v51, %v2213_v44  ;;  %v2218_v53 = vor.u32 %v2565_v35, %v2215_v52  ;;  %v1112_v44 = vperm.slane %v2870_v46, 0  ;;  %v2298_v35 = vor.u32 %v2585_v6, %v2295_v15 }
  0x9a   :  { %1319 = vmatpush.bf16.msra.mxu0 %v2222_v50  ;;  %v2294_v50 = vor.u32 %v2586_v14, %v2293_v49  ;;  %1357 = vmatpush.bf16.msra.mxu3 %v2298_v35  ;;  %v229_v14 = vperm.slane %v2864_v12, 1  ;;  %v1113_v12 = vperm.slane %v2870_v46, 1 }
  0x9c   :  { %1345 = vmatpush.bf16.msra.mxu2 %v2226_v39  ;;  %1331 = vmatpush.bf16.msra.mxu1 %v2294_v50 }
  0x9e   :  { %1320 = vmatpush.bf16.msra.mxu0 %v2214_v40  ;;  %1358 = vmatpush.bf16.msra.mxu3 %v2290_v62 }
  0xa0   :  { %1346 = vmatpush.bf16.msra.mxu2 %v2218_v53  ;;  %v2285_v53 = vld [vmem:[#allocation7 + $0xe0] sm:$0xf] }
  0xa2   :  { %1321 = vmatpush.bf16.msra.mxu0 %v2206_v57  ;;  %v2286_v57 = vor.u32 %v2584_v54, %v2285_v53 }
  0xa4   :  { %1347 = vmatpush.bf16.msra.mxu2 %v2210_v59  ;;  %v2277_v59 = vld [vmem:[#allocation7 + $0xd0] sm:$0xf]  ;;  %1332 = vmatpush.bf16.msra.mxu1 %v2286_v57 }
  0xa5   :  { %v2278_v4 = vor.u32 %v2582_v60, %v2277_v59 }
  0xa6   :  { %1322 = vmatpush.bf16.msra.mxu0 %v2198_v63  ;;  %v2581_v63 = vld [vmem:[#allocation7 + $0xd4] sm:$0xf] }
  0xa7   :  { %v2282_v5 = vor.u32 %v2581_v63, %v2279_v0 }
  0xa8   :  { %1348 = vmatpush.bf16.msra.mxu2 %v2202_v2  ;;  %1333 = vmatpush.bf16.msra.mxu1 %v2278_v4  ;;  %v2601_v4 = vld [vmem:[#allocation8 + $0x74] sm:$0xf] }
  0xa9   :  { %1359 = vmatpush.bf16.msra.mxu3 %v2282_v5 }
  0xaa   :  { %1323 = vmatpush.bf16.msra.mxu0 %v2190_v8  ;;  %v2580_v8 = vld [vmem:[#allocation7 + $0xc4] sm:$0xf0] }
  0xac   :  { %1349 = vmatpush.bf16.msra.mxu2 %v2194_v11 }
  0xae   :  { %1324 = vmatpush.bf16.msra.mxu0 %v2182_v19  ;;  %v2262_v19 = vor.u32 %v2578_v17, %v2261_v16  ;;  %v2421_v16 = vld [vmem:[#allocation8 + $0xf0] sm:$0xf]  ;;  %v2618_v17 = vld [vmem:[#allocation8 + $0xf4] sm:$0xf0] }
  0xb0   :  { %1350 = vmatpush.bf16.msra.mxu2 %v2186_v21  ;;  %v2266_v21 = vor.u32 %v2577_v18, %v2263_v20  ;;  %v2617_v18 = vld [vmem:[#allocation8 + $0xf4] sm:$0xf] }
  0xb2   :  { %v909_v7 = vpop.f32.mrf.mxu0  ;;  %1325 = vmatpush.bf16.msra.mxu0 %v2174_v28  ;;  %v2255_v28 = vld [vmem:[#allocation7 + $0xa8] sm:$0xf0] }
  0xb3   :  { %v922_v10 = vpop.f32.mrf.mxu1  ;;  %v910_v32 = vadd.f32 %v909_v7, %v228_v22  ;;  %v2269_v7 = vld [vmem:[#allocation7 + $0xc0] sm:$0xf]  ;;  %v2258_v29 = vor.u32 %v2575_v26, %v2255_v28  ;;  %v2343_v26 = vld [vmem:[#allocation8 + $0x58] sm:$0xf0]  ;;  %v2616_v28 = vld [vmem:[#allocation8 + $0xe4] sm:$0xf0] }
  0xb4   :  { %1351 = vmatpush.bf16.msra.mxu2 %v2178_v31  ;;  %v2270_v11 = vor.u32 %v2580_v8, %v2269_v7  ;;  %v2245_v31 = vld [vmem:[#allocation7 + $0x90] sm:$0xf]  ;;  %v2359_v7 = vld [vmem:[#allocation8 + $0x78] sm:$0xf0]  ;;  %v2349_v8 = vld [vmem:[#allocation8 + $0x60] sm:$0xf] }
  0xb5   :  { %v923_v36 = vadd.f32 %v922_v10, %v910_v32  ;;  %v2271_v10 = vld [vmem:[#allocation7 + $0xc8] sm:$0xf0]  ;;  %v2574_v32 = vld [vmem:[#allocation7 + $0x94] sm:$0xf0] }
  0xb6   :  { %1334 = vmatpush.bf16.msra.mxu1 %v2270_v11  ;;  %v2599_v11 = vld [vmem:[#allocation8 + $0x64] sm:$0xf] }
  0xba   :  { %v935_v13 = vpop.f32.mrf.mxu2  ;;  %v911_v27 = vpop.f32.mrf.mxu0  ;;  %1335 = vmatpush.bf16.msra.mxu1 %v2262_v19  ;;  %v2423_v19 = vld [vmem:[#allocation8 + $0xf8] sm:$0xf0] }
  0xbb   :  { %v948_v23 = vpop.f32.mrf.mxu3  ;;  %v924_v30 = vpop.f32.mrf.mxu1  ;;  %v936_v37 = vadd.f32 %v935_v13, %v923_v36  ;;  %v2274_v13 = vor.u32 %v2579_v9, %v2271_v10  ;;  %v2254_v27 = vor.u32 %v2576_v25, %v2253_v24  ;;  %v2246_v36 = vor.u32 %v2574_v32, %v2245_v31  ;;  %v2600_v9 = vld [vmem:[#allocation8 + $0x64] sm:$0xf0]  ;;  %v2598_v24 = vld [vmem:[#allocation8 + $0x54] sm:$0xf0]  ;;  %v2597_v25 = vld [vmem:[#allocation8 + $0x54] sm:$0xf] }
  0xbc   :  { %v2362_v10 = vor.u32 %v2601_v4, %v2359_v7  ;;  %v2350_v46 = vor.u32 %v2600_v9, %v2349_v8  ;;  %v2415_v31 = vld [vmem:[#allocation8 + $0xe8] sm:$0xf0]  ;;  %v2309_v9 = vld [vmem:[#allocation8 + $0x10] sm:$0xf] }
  0xbd   :  { %v949_v38 = vadd.f32 %v948_v23, %v936_v37  ;;  %1360 = vmatpush.bf16.msra.mxu3 %v2274_v13  ;;  %v2247_v37 = vld [vmem:[#allocation7 + $0x98] sm:$0xf0]  ;;  %v2351_v13 = vld [vmem:[#allocation8 + $0x68] sm:$0xf0] }
  0xbe   :  { %1336 = vmatpush.bf16.msra.mxu1 %v2254_v27  ;;  %1598 = vmatpush.bf16.msrb.mxu2 %v2362_v10  ;;  %v2354_v20 = vor.u32 %v2599_v11, %v2351_v13  ;;  %v2413_v27 = vld [vmem:[#allocation8 + $0xe0] sm:$0xf]  ;;  %v2590_v10 = vld [vmem:[#allocation8 + $0x14] sm:$0xf0]  ;;  %v2589_v11 = vld [vmem:[#allocation8 + $0x14] sm:$0xf] }
  0xbf   :  { %v2310_v13 = vor.u32 %v2590_v10, %v2309_v9 }
  0xc1   :  { %1361 = vmatpush.bf16.msra.mxu3 %v2266_v21  ;;  %v2422_v21 = vor.u32 %v2618_v17, %v2421_v16  ;;  %v2311_v16 = vld [vmem:[#allocation8 + $0x18] sm:$0xf0]  ;;  %v2381_v17 = vld [vmem:[#allocation8 + $0xa0] sm:$0xf] }
  0xc2   :  { %v937_v33 = vpop.f32.mrf.mxu2  ;;  %1337 = vmatpush.bf16.msra.mxu1 %v2246_v36  ;;  %v2596_v36 = vld [vmem:[#allocation8 + $0x44] sm:$0xf0]  ;;  %1599 = vmatpush.bf16.msrb.mxu2 %v2354_v20 }
  0xc3   :  { %v950_v34 = vpop.f32.mrf.mxu3  ;;  %v2573_v33 = vld [vmem:[#allocation7 + $0x94] sm:$0xf] }
  0xc5   :  { %1362 = vmatpush.bf16.msra.mxu3 %v2258_v29  ;;  %v2414_v29 = vor.u32 %v2616_v28, %v2413_v27  ;;  %v2303_v27 = vld [vmem:[#allocation8 + $0x8] sm:$0xf0] }
  0xd2   :  { %v961_v41 = vpop.f32.mrf.mxu0 }
  0xd3   :  { %v962_v42 = vadd.f32 %v961_v41, %v949_v38  ;;  %v974_v43 = vpop.f32.mrf.mxu1  ;;  %v2250_v38 = vor.u32 %v2573_v33, %v2247_v37  ;;  %v2346_v37 = vor.u32 %v2597_v25, %v2343_v26  ;;  %v2587_v25 = vld [vmem:[#allocation8 + $0x4] sm:$0xf] }
  0xd4   :  { %v2306_v28 = vor.u32 %v2587_v25, %v2303_v27 }
  0xd5   :  { %v975_v1 = vadd.f32 %v974_v43, %v962_v42  ;;  %1363 = vmatpush.bf16.msra.mxu3 %v2250_v38  ;;  %v2237_v43 = vld [vmem:[#allocation7 + $0x80] sm:$0xf]  ;;  %v2405_v38 = vld [vmem:[#allocation8 + $0xd0] sm:$0xf]  ;;  %1600 = vmatpush.bf16.msrb.mxu2 %v2346_v37  ;;  %v2604_v37 = vld [vmem:[#allocation8 + $0x84] sm:$0xf0] }
  0xda   :  { %v987_v45 = vpop.f32.mrf.mxu2  ;;  %v963_v51 = vpop.f32.mrf.mxu0 }
  0xdb   :  { %v988_v47 = vadd.f32 %v987_v45, %v975_v1  ;;  %v1000_v48 = vpop.f32.mrf.mxu3  ;;  %v976_v40 = vpop.f32.mrf.mxu1  ;;  %v2572_v1 = vld [vmem:[#allocation7 + $0x84] sm:$0xf0]  ;;  %v2571_v45 = vld [vmem:[#allocation7 + $0x84] sm:$0xf] }
  0xdd   :  { %v1001_v39 = vadd.f32 %v1000_v48, %v988_v47  ;;  %v2238_v47 = vor.u32 %v2572_v1, %v2237_v43  ;;  %v2239_v48 = vld [vmem:[#allocation7 + $0x88] sm:$0xf0]  ;;  %v2595_v43 = vld [vmem:[#allocation8 + $0x44] sm:$0xf] }
  0xde   :  { %v2242_v49 = vor.u32 %v2571_v45, %v2239_v48  ;;  %v2335_v1 = vld [vmem:[#allocation8 + $0x48] sm:$0xf0]  ;;  %v2407_v45 = vld [vmem:[#allocation8 + $0xd8] sm:$0xf0] }
  0xdf   :  { %v1108_v52 = vmax.f32 %v1001_v39, 0.0  ;;  %1338 = vmatpush.bf16.msra.mxu1 %v2238_v47 }
  0xe0   :  { %1364 = vmatpush.bf16.msra.mxu3 %v2242_v49  ;;  %v2397_v49 = vld [vmem:[#allocation8 + $0xc0] sm:$0xf] }
  0xe1   :  { %v1116_v56 = vadd.f32 %v1112_v44, %v1108_v52 }
  0xe2   :  { %v989_v61 = vpop.f32.mrf.mxu2 }
  0xe3   :  { %v1118_v2 = vpack.c.bf16 %v1116_v56, %v1116_v56  ;;  %v1002_v3 = vpop.f32.mrf.mxu3  ;;  %1585 = vmatpush.bf16.msrb.mxu1 %v2422_v21  ;;  %v2383_v21 = vld [vmem:[#allocation8 + $0xa8] sm:$0xf0] }
  0xe4   :  { %v2602_v3 = vld [vmem:[#allocation8 + $0x74] sm:$0xf0] }
  0xe5   :  { %1326 = vmatmul.bf16.vlgmr.msra.gmra.mxu0 %v1118_v2  ;;  %1352 = vmatmul.bf16.vlgmr.msra.gmra.mxu2 %v1118_v2  ;;  %v2357_v2 = vld [vmem:[#allocation8 + $0x70] sm:$0xf] }
  0xe6   :  { %v2358_v5 = vor.u32 %v2602_v3, %v2357_v2 }
  0xe7   :  { %1586 = vmatpush.bf16.msrb.mxu1 %v2414_v29  ;;  %v2373_v29 = vld [vmem:[#allocation8 + $0x90] sm:$0xf] }
  0xe8   :  { %1572 = vmatpush.bf16.msrb.mxu0 %v2358_v5 }
  0xec   :  { %1573 = vmatpush.bf16.msrb.mxu0 %v2350_v46  ;;  %v2314_v46 = vor.u32 %v2589_v11, %v2311_v16 }
  0xf2   :  { %v1013_v22 = vpop.f32.mrf.mxu0 }
  0xf3   :  { %v1026_v23 = vpop.f32.mrf.mxu1  ;;  %v1014_v15 = vadd.f32 %v1013_v22, %v229_v14  ;;  %v2426_v22 = vor.u32 %v2617_v18, %v2423_v19  ;;  %v2608_v18 = vld [vmem:[#allocation8 + $0xa4] sm:$0xf0]  ;;  %v2607_v19 = vld [vmem:[#allocation8 + $0xa4] sm:$0xf] }
  0xf4   :  { %v2382_v20 = vor.u32 %v2608_v18, %v2381_v17 }
  0xf5   :  { %v1027_v39 = vadd.f32 %v1026_v23, %v1014_v15  ;;  %v2341_v23 = vld [vmem:[#allocation8 + $0x50] sm:$0xf]  ;;  %1611 = vmatpush.bf16.msrb.mxu3 %v2426_v22  ;;  %v2399_v15 = vld [vmem:[#allocation8 + $0xc8] sm:$0xf0]  ;;  %v2386_v22 = vor.u32 %v2607_v19, %v2383_v21 }
  0xf6   :  { %v2342_v32 = vor.u32 %v2598_v24, %v2341_v23  ;;  %v2301_v23 = vld [vmem:[#allocation8] sm:$0xf]  ;;  %v2588_v24 = vld [vmem:[#allocation8 + $0x4] sm:$0xf0] }
  0xf7   :  { %v2302_v26 = vor.u32 %v2588_v24, %v2301_v23 }
  0xf8   :  { %1574 = vmatpush.bf16.msrb.mxu0 %v2342_v32 }
  0xfa   :  { %v1039_v30 = vpop.f32.mrf.mxu2  ;;  %v1015_v41 = vpop.f32.mrf.mxu0 }
  0xfb   :  { %v1052_v34 = vpop.f32.mrf.mxu3  ;;  %v1028_v42 = vpop.f32.mrf.mxu1  ;;  %v1040_v44 = vadd.f32 %v1039_v30, %v1027_v39  ;;  %v2615_v30 = vld [vmem:[#allocation8 + $0xe4] sm:$0xf]  ;;  %v2614_v41 = vld [vmem:[#allocation8 + $0xd4] sm:$0xf0]  ;;  %v2338_v39 = vor.u32 %v2595_v43, %v2335_v1 }
  0xfc   :  { %v2418_v33 = vor.u32 %v2615_v30, %v2415_v31  ;;  %v2613_v42 = vld [vmem:[#allocation8 + $0xd4] sm:$0xf]  ;;  %v2406_v47 = vor.u32 %v2614_v41, %v2405_v38  ;;  %v2606_v30 = vld [vmem:[#allocation8 + $0x94] sm:$0xf0]  ;;  %v2603_v38 = vld [vmem:[#allocation8 + $0x84] sm:$0xf] }
  0xfd   :  { %v1053_v51 = vadd.f32 %v1052_v34, %v1040_v44  ;;  %v2333_v34 = vld [vmem:[#allocation8 + $0x40] sm:$0xf]  ;;  %v2410_v48 = vor.u32 %v2613_v42, %v2407_v45  ;;  %v2325_v44 = vld [vmem:[#allocation8 + $0x30] sm:$0xf]  ;;  %1601 = vmatpush.bf16.msrb.mxu2 %v2338_v39  ;;  %v2605_v31 = vld [vmem:[#allocation8 + $0x94] sm:$0xf]  ;;  %v2374_v32 = vor.u32 %v2606_v30, %v2373_v29 }
  0xfe   :  { %1612 = vmatpush.bf16.msrb.mxu3 %v2418_v33  ;;  %v2334_v14 = vor.u32 %v2596_v36, %v2333_v34  ;;  %1587 = vmatpush.bf16.msrb.mxu1 %v2406_v47  ;;  %v2375_v33 = vld [vmem:[#allocation8 + $0x98] sm:$0xf0]  ;;  %v2365_v36 = vld [vmem:[#allocation8 + $0x80] sm:$0xf]  ;;  %v2367_v42 = vld [vmem:[#allocation8 + $0x88] sm:$0xf0] }
  0xff   :  { %v2378_v34 = vor.u32 %v2605_v31, %v2375_v33  ;;  %v2366_v41 = vor.u32 %v2604_v37, %v2365_v36  ;;  %v2370_v43 = vor.u32 %v2603_v38, %v2367_v42  ;;  %v1626_v1 = vld [vmem:[%s2891_s1] sm:$0xff]  ;;  %v2764_v45 = vmov 0  }
 0x100   :  { %1575 = vmatpush.bf16.msrb.mxu0 %v2334_v14  ;;  %2628 = vset.pattern.permute.xlu0 %v2764_v45  ;;  %v1152_v47 = vld [vmem:[%s2896_s6] sm:$0x3] }
 0x101   :  { %1629 = vperm.xlu0 %2628, %v1626_v1  }
 0x102   :  { %v1041_v6 = vpop.f32.mrf.mxu2  ;;  %1613 = vmatpush.bf16.msrb.mxu3 %v2410_v48  ;;  %v2765_v48 = vmov 1  }
 0x103   :  { %v1054_v50 = vpop.f32.mrf.mxu3  ;;  %v2612_v6 = vld [vmem:[#allocation8 + $0xc4] sm:$0xf0] }
 0x104   :  { %v2611_v50 = vld [vmem:[#allocation8 + $0xc4] sm:$0xf] }
 0x109   :  { %2629 = vset.pattern.permute.xlu0 %v2765_v48 }
 0x10a   :  { %1634 = vperm.xlu0 %2629, %v1626_v1  }
 0x112   :  { %v1065_v35 = vpop.f32.mrf.mxu0 }
 0x113   :  { %v1078_v40 = vpop.f32.mrf.mxu1  ;;  %v1066_v52 = vadd.f32 %v1065_v35, %v1053_v51  ;;  %v2594_v51 = vld [vmem:[#allocation8 + $0x34] sm:$0xf0]  ;;  %v2593_v35 = vld [vmem:[#allocation8 + $0x34] sm:$0xf] }
 0x115   :  { %v1079_v53 = vadd.f32 %v1078_v40, %v1066_v52  ;;  %v2327_v40 = vld [vmem:[#allocation8 + $0x38] sm:$0xf0]  ;;  %v2398_v52 = vor.u32 %v2612_v6, %v2397_v49  ;;  %v1154_v49 = vperm.slane %v1152_v47, 0 }
 0x117   :  { %1588 = vmatpush.bf16.msrb.mxu1 %v2398_v52 }
 0x11a   :  { %v1091_v54 = vpop.f32.mrf.mxu2  ;;  %v1067_v57 = vpop.f32.mrf.mxu0 }
 0x11b   :  { %v1092_v55 = vadd.f32 %v1091_v54, %v1079_v53  ;;  %v1104_v56 = vpop.f32.mrf.mxu3  ;;  %v1080_v58 = vpop.f32.mrf.mxu1  ;;  %v2402_v53 = vor.u32 %v2611_v50, %v2399_v15  ;;  %v2389_v54 = vld [vmem:[#allocation8 + $0xb0] sm:$0xf]  ;;  %v2609_v57 = vld [vmem:[#allocation8 + $0xb4] sm:$0xf]  ;;  %v1155_v50 = vperm.slane %v1152_v47, 1 }
 0x11c   :  { %v2391_v58 = vld [vmem:[#allocation8 + $0xb8] sm:$0xf0] }
 0x11d   :  { %v1105_v59 = vadd.f32 %v1104_v56, %v1092_v55  ;;  %v2326_v55 = vor.u32 %v2594_v51, %v2325_v44  ;;  %v2610_v56 = vld [vmem:[#allocation8 + $0xb4] sm:$0xf0]  ;;  %1614 = vmatpush.bf16.msrb.mxu3 %v2402_v53  ;;  %v2394_v2 = vor.u32 %v2609_v57, %v2391_v58 }
 0x11f   :  { %v1109_v60 = vmax.f32 %v1105_v59, 0.0  ;;  %v2330_v59 = vor.u32 %v2593_v35, %v2327_v40  ;;  %1576 = vmatpush.bf16.msrb.mxu0 %v2326_v55 }
 0x121   :  { %v1117_v61 = vadd.f32 %v1113_v12, %v1109_v60  ;;  %v2317_v12 = vld [vmem:[#allocation8 + $0x20] sm:$0xf]  ;;  %v2592_v60 = vld [vmem:[#allocation8 + $0x24] sm:$0xf0]  ;;  %1602 = vmatpush.bf16.msrb.mxu2 %v2330_v59  ;;  %1615 = vmatpush.bf16.msrb.mxu3 %v2394_v2 }
 0x122   :  { %v1093_v62 = vpop.f32.mrf.mxu2  ;;  %v2318_v3 = vor.u32 %v2592_v60, %v2317_v12 }
 0x123   :  { %v1119_v63 = vpack.c.bf16 %v1117_v61, %v1117_v61  ;;  %v1106_v0 = vpop.f32.mrf.mxu3  ;;  %v2591_v61 = vld [vmem:[#allocation8 + $0x24] sm:$0xf]  ;;  %v2319_v62 = vld [vmem:[#allocation8 + $0x28] sm:$0xf0] }
 0x124   :  { %v2390_v0 = vor.u32 %v2610_v56, %v2389_v54  ;;  %v2322_v4 = vor.u32 %v2591_v61, %v2319_v62  ;;  %1577 = vmatpush.bf16.msrb.mxu0 %v2318_v3  ;;  %v1406_v56 = vld [vmem:[%s2898_s8] sm:$0x3] }
 0x125   :  { %1339 = vmatmul.bf16.vlgmr.msra.gmra.mxu1 %v1119_v63  ;;  %1365 = vmatmul.bf16.vlgmr.msra.gmra.mxu3 %v1119_v63  ;;  %v1408_v58 = vperm.slane %v1406_v56, 0  ;;  %v1409_v62 = vperm.slane %v1406_v56, 1 }
 0x126   :  { %1589 = vmatpush.bf16.msrb.mxu1 %v2390_v0  ;;  %1603 = vmatpush.bf16.msrb.mxu2 %v2322_v4 }
 0x127   :  { %1616 = vmatpush.bf16.msrb.mxu3 %v2386_v22 }
 0x128   :  { %1578 = vmatpush.bf16.msrb.mxu0 %v2310_v13 }
 0x12a   :  { %1604 = vmatpush.bf16.msrb.mxu2 %v2314_v46  ;;  %1590 = vmatpush.bf16.msrb.mxu1 %v2382_v20 }
 0x12b   :  { %1617 = vmatpush.bf16.msrb.mxu3 %v2378_v34 }
 0x12c   :  { %1579 = vmatpush.bf16.msrb.mxu0 %v2302_v26 }
 0x12e   :  { %1605 = vmatpush.bf16.msrb.mxu2 %v2306_v28  ;;  %1591 = vmatpush.bf16.msrb.mxu1 %v2374_v32 }
 0x12f   :  { %1618 = vmatpush.bf16.msrb.mxu3 %v2370_v43 }
 0x132   :  { %1592 = vmatpush.bf16.msrb.mxu1 %v2366_v41 }
 0x162   :  { %v2875_v63 = vpop.f32.mrf.mxu0 }
 0x163   :  { %v1328_v14 = vadd.f32 %v2875_v63, %v1154_v49 }
 0x168   :  { %v1353_v5 = vpop.f32.mrf.mxu2 }
 0x169   :  { %v1354_v44 = vadd.f32 %v1353_v5, %v1155_v50 }
 0x16a   :  { %v1329_v7 = vpop.f32.mrf.mxu0 }
 0x170   :  { %v1355_v8 = vpop.f32.mrf.mxu2 }
 0x173   :  { %v1630_v59 = vpop.permute.xlu0 %1629 }
 0x17c   :  { %v1635_v7 = vpop.permute.xlu0 %1634 }
 0x1a2   :  { %v1340_v6 = vpop.f32.mrf.mxu1 }
 0x1a3   :  { %v1341_v15 = vadd.f32 %v1340_v6, %v1328_v14 }
 0x1a5   :  { %v1370_v39 = vmax.f32 %v1341_v15, 0.0 }
 0x1a7   :  { %v1372_v51 = vpack.c.bf16 %v1370_v39, %v1370_v39 }
 0x1a8   :  { %v1366_v35 = vpop.f32.mrf.mxu3 }
 0x1a9   :  { %v1367_v40 = vadd.f32 %v1366_v35, %v1354_v44  ;;  %1580 = vmatmul.bf16.vlgmr.msrb.gmra.mxu0 %v1372_v51  ;;  %1606 = vmatmul.bf16.vlgmr.msrb.gmra.mxu2 %v1372_v51 }
 0x1aa   :  { %v1342_v52 = vpop.f32.mrf.mxu1 }
 0x1ab   :  { %v1371_v53 = vmax.f32 %v1367_v40, 0.0 }
 0x1ad   :  { %v1373_v54 = vpack.c.bf16 %v1371_v53, %v1371_v53 }
 0x1af   :  { %1593 = vmatmul.bf16.vlgmr.msrb.gmra.mxu1 %v1373_v54  ;;  %1619 = vmatmul.bf16.vlgmr.msrb.gmra.mxu3 %v1373_v54 }
 0x1b0   :  { %v1368_v55 = vpop.f32.mrf.mxu3 }
 0x226   :  { %v1581_v57 = vpop.f32.mrf.mxu0 }
 0x227   :  { %v1582_v61 = vadd.f32 %v1581_v57, %v1408_v58 }
 0x22c   :  { %v1594_v12 = vpop.f32.mrf.mxu1  ;;  %v1607_v60 = vpop.f32.mrf.mxu2 }
 0x22d   :  { %v1595_v0 = vadd.f32 %v1594_v12, %v1582_v61  ;;  %v1608_v2 = vadd.f32 %v1607_v60, %v1409_v62 }
 0x22e   :  { %v1583_v63 = vpop.f32.mrf.mxu0 }
 0x22f   :  { %v1624_v4 = vmax.f32 %v1595_v0, 0.0 }
 0x231   :  { %v1632_v11 = vmul.f32 %v1630_v59, %v1624_v4 }
 0x232   :  { %v1620_v3 = vpop.f32.mrf.mxu3 }
 0x233   :  { %v1621_v5 = vadd.f32 %v1620_v3, %v1608_v2 }
 0x234   :  { %v1596_v8 = vpop.f32.mrf.mxu1  ;;  %v1609_v9 = vpop.f32.mrf.mxu2 }
 0x235   :  { %v1625_v10 = vmax.f32 %v1621_v5, 0.0 }
 0x237   :  { %v1637_v13 = vmul.f32 %v1635_v7, %v1625_v10 }
 0x239   :  { %v1638_v16 = vadd.f32 %v1637_v13, %v1632_v11 }
 0x23a   :  { %v1622_v46 = vpop.f32.mrf.mxu3 }
 0x23b   :  { %1639 = vst [vmem:[#allocation10] sm:$0xff] %v1638_v16 }
 0x23c   :  { %1650 = dma.vmem_to_hbm [thread:$0]  %s1646_s13, 128, %s1648_s15, [#allocation4]  }
 0x23d   :  { %2756 = dma.done.wait [#allocation4], 128  }
 0x23e   :  { %2757 = vsyncadd [#allocation4], 4294967168 }
 0x23f   :  { %1655 = vsyncpa [#allocation3], 1 }
 0x240   :  { %1656 = vsyncpa [#allocation6], 1 }
 0x241   :  { %1657 = vsyncpa [#allocation9], 1 }
 0x242   :  { %1658 = vsyncpa [#allocation4], 1 }

</bundles_post_ra>
